<compile_context>
chip_gen: v7x
topology: tpu7x:2x2x1
jax: 0.10.0
libtpu: 0.0.40
codegen_flags: <defaults>
</compile_context>

<pallas_src>
import math
import jax
import jax.numpy as jnp
from jax import lax
from jax.experimental import pallas as pl
from jax.experimental.pallas import tpu as pltpu


# ----------------------------------------------------------------------------
# Pallas kernels
# ----------------------------------------------------------------------------
def dense_kernel(x_ref, w_ref, b_ref, y_ref):
    """(tm, K) @ (K, N) + (1, N) -> (tm, N): one MXU-shaped matmul tile."""
    y_ref[...] = (jnp.dot(x_ref[...], w_ref[...],
                          preferred_element_type=jnp.float32)
                  + b_ref[...])


def lstm_recurrent_kernel(xg_ref, whh_ref, h0_ref, c0_ref,
                          y_ref, hT_ref, cT_ref, h_sc, c_sc):
    """Recurrent part of one LSTM layer. Grid axis 0 = time block (sequential).

    xg_ref  : (TB, 4, B, H) precomputed x@W_ih^T + (b_ih + b_hh), gate-major
    whh_ref : (4, H, H)     per-gate recurrent weights, h @ whh_ref[g]
    h0/c0   : (B, H)        initial state
    y_ref   : (TB, B, H)    hidden output for this time block
    hT/cT   : (B, H)        final state (written on last grid iteration)
    h_sc/c_sc : VMEM scratch carrying state across grid iterations
    """
    blk = pl.program_id(0)

    @pl.when(blk == 0)
    def _():
        h_sc[...] = h0_ref[...]
        c_sc[...] = c0_ref[...]

    # Loop-invariant weight loads hoisted out of the time loop.
    w_i = whh_ref[0]
    w_f = whh_ref[1]
    w_g = whh_ref[2]
    w_o = whh_ref[3]

    tb = xg_ref.shape[0]

    def step(t, carry):
        h, c = carry
        xg = xg_ref[t]                                   # (4, B, H)
        i_pre = xg[0] + jnp.dot(h, w_i, preferred_element_type=jnp.float32)
        f_pre = xg[1] + jnp.dot(h, w_f, preferred_element_type=jnp.float32)
        g_pre = xg[2] + jnp.dot(h, w_g, preferred_element_type=jnp.float32)
        o_pre = xg[3] + jnp.dot(h, w_o, preferred_element_type=jnp.float32)
        i_g = jax.nn.sigmoid(i_pre)
        f_g = jax.nn.sigmoid(f_pre)
        g_g = jnp.tanh(g_pre)
        o_g = jax.nn.sigmoid(o_pre)
        c_new = f_g * c + i_g * g_g
        h_new = o_g * jnp.tanh(c_new)
        y_ref[t] = h_new
        return (h_new, c_new)

    h, c = lax.fori_loop(0, tb, step, (h_sc[...], c_sc[...]), unroll=True)
    h_sc[...] = h
    c_sc[...] = c

    @pl.when(blk == pl.num_programs(0) - 1)
    def _():
        hT_ref[...] = h
        cT_ref[...] = c


# ----------------------------------------------------------------------------
# Wrappers calling pallas_call
# ----------------------------------------------------------------------------
def _row_tile(m):
    for tm in (512, 256, 128, 64, 32, 16, 8):
        if m % tm == 0:
            return tm
    return m


def _time_block(t, max_tb=32):
    tb = 1
    for d in range(1, min(t, max_tb) + 1):
        if t % d == 0:
            tb = d
    return tb


def dense(x, w_t, b_row):
    """x:(M,K) @ w_t:(K,N) + b_row:(1,N) -> (M,N); rows tiled, grid parallel."""
    M, K = x.shape
    N = w_t.shape[-1]
    tm = _row_tile(M)
    return pl.pallas_call(
        dense_kernel,
        out_shape=jax.ShapeDtypeStruct((M, N), jnp.float32),
        grid_spec=pltpu.PrefetchScalarGridSpec(
            num_scalar_prefetch=0,
            grid=(M // tm,),
            in_specs=[
                pl.BlockSpec((tm, K), lambda i: (i, 0)),
                pl.BlockSpec((K, N), lambda i: (0, 0)),
                pl.BlockSpec((1, N), lambda i: (0, 0)),
            ],
            out_specs=pl.BlockSpec((tm, N), lambda i: (i, 0)),
        ),
        compiler_params=pltpu.CompilerParams(
            dimension_semantics=("parallel",)),
    )(x, w_t, b_row)


def lstm_recurrent(xg, whh_g, h0, c0):
    """xg: (T,4,B,H) precomputed input gates; whh_g: (4,H,H); h0/c0: (B,H)."""
    T = xg.shape[0]
    B, H = h0.shape
    tb = _time_block(T)
    out_shape = (jax.ShapeDtypeStruct((T, B, H), jnp.float32),
                 jax.ShapeDtypeStruct((B, H), jnp.float32),
                 jax.ShapeDtypeStruct((B, H), jnp.float32))
    return pl.pallas_call(
        lstm_recurrent_kernel,
        out_shape=out_shape,
        grid_spec=pltpu.PrefetchScalarGridSpec(
            num_scalar_prefetch=0,
            grid=(T // tb,),
            in_specs=[
                pl.BlockSpec((tb, 4, B, H), lambda i: (i, 0, 0, 0)),
                pl.BlockSpec((4, H, H), lambda i: (0, 0, 0)),
                pl.BlockSpec((B, H), lambda i: (0, 0)),
                pl.BlockSpec((B, H), lambda i: (0, 0)),
            ],
            out_specs=[
                pl.BlockSpec((tb, B, H), lambda i: (i, 0, 0)),
                pl.BlockSpec((B, H), lambda i: (0, 0)),
                pl.BlockSpec((B, H), lambda i: (0, 0)),
            ],
            scratch_shapes=[pltpu.VMEM((B, H), jnp.float32),
                            pltpu.VMEM((B, H), jnp.float32)],
        ),
        compiler_params=pltpu.CompilerParams(
            dimension_semantics=("arbitrary",)),
    )(xg, whh_g, h0, c0)


# ----------------------------------------------------------------------------
# Parameters (PyTorch-style layout) + one-time preparation (hoisted transposes)
# ----------------------------------------------------------------------------
def init_params(key, vocab_size, num_hiddens, num_layers):
    """Deterministic init mimicking PyTorch's uniform(-1/sqrt(H), 1/sqrt(H))."""
    k = 1.0 / math.sqrt(num_hiddens)
    params = {"lstm": []}
    for layer in range(num_layers):
        in_size = vocab_size if layer == 0 else num_hiddens
        key, k1, k2, k3, k4 = jax.random.split(key, 5)
        w_ih = jax.random.uniform(k1, (4 * num_hiddens, in_size),
                                  jnp.float32, -k, k)
        w_hh = jax.random.uniform(k2, (4 * num_hiddens, num_hiddens),
                                  jnp.float32, -k, k)
        b_ih = jax.random.uniform(k3, (4 * num_hiddens,), jnp.float32, -k, k)
        b_hh = jax.random.uniform(k4, (4 * num_hiddens,), jnp.float32, -k, k)
        params["lstm"].append((w_ih, w_hh, b_ih, b_hh))
    key, k1, k2 = jax.random.split(key, 3)
    params["lin_w"] = jax.random.uniform(k1, (vocab_size, num_hiddens),
                                         jnp.float32, -k, k)
    params["lin_b"] = jax.random.uniform(k2, (vocab_size,),
                                         jnp.float32, -k, k)
    return params


def prepare_params(params):
    """One-time weight prep (transposes / bias combine) hoisted out of forward."""
    prepped = {"layers": []}
    for (w_ih, w_hh, b_ih, b_hh) in params["lstm"]:
        H = w_hh.shape[-1]
        wih_t = jnp.transpose(w_ih)                              # (IN, 4H)
        # (4, H, H): h @ whh_g[g] == (h @ W_hh^T)[:, g*H:(g+1)*H]
        whh_g = jnp.transpose(jnp.transpose(w_hh).reshape(H, 4, H), (1, 0, 2))
        bias = b_ih + b_hh                                       # (4H,)
        prepped["layers"].append({"wih_t": wih_t, "whh_g": whh_g, "bias": bias})
    prepped["lin_w_t"] = jnp.transpose(params["lin_w"])          # (H, V)
    prepped["lin_b"] = params["lin_b"].reshape(1, -1)            # (1, V)
    return prepped


# ----------------------------------------------------------------------------
# My_LSTM forward (Pallas implementation)
# ----------------------------------------------------------------------------
def my_lstm_forward(prepped, X, state):
    """X: (batch, seq) int tokens.  state: (h, c) each (L, B, H)."""
    h0_all, c0_all = state
    B, T = X.shape
    H = h0_all.shape[-1]
    tokens = jnp.transpose(X.astype(jnp.int32))                  # (T, B)

    hs, cs = [], []
    layer_out = None
    for l, lp in enumerate(prepped["layers"]):
        if l == 0:
            # one_hot(X) @ W_ih^T == row gather of W_ih^T: skip the one-hot
            # materialization and the V-wide matmul entirely.
            xg_flat = jnp.take(lp["wih_t"], tokens, axis=0) + lp["bias"]
        else:
            # Hoisted input->gate matmul over all timesteps at once.
            xg_flat = dense(layer_out.reshape(T * B, H),
                            lp["wih_t"],
                            lp["bias"].reshape(1, -1)).reshape(T, B, 4 * H)
        # gate-major (T, 4, B, H): each gate addressed by a leading index,
        # H stays the full lane dim -> no misaligned lane slicing in-kernel.
        xg = jnp.transpose(xg_flat.reshape(T, B, 4, H), (0, 2, 1, 3))
        y, hT, cT = lstm_recurrent(xg, lp["whh_g"], h0_all[l], c0_all[l])
        layer_out = y
        hs.append(hT)
        cs.append(cT)
    # dropout=0 in the module -> no inter-layer dropout.

    V = prepped["lin_w_t"].shape[-1]
    out = dense(layer_out.reshape(T * B, H),
                prepped["lin_w_t"], prepped["lin_b"]).reshape(T, B, V)
    return out, (jnp.stack(hs, 0), jnp.stack(cs, 0))


# ----------------------------------------------------------------------------
# Pure-JAX reference for correctness check
# ----------------------------------------------------------------------------
def ref_forward(params, X, state, vocab_size):
    h0_all, c0_all = state
    x = jax.nn.one_hot(X.astype(jnp.int32), vocab_size, dtype=jnp.float32)
    x = jnp.transpose(x, (1, 0, 2))
    hs, cs = [], []
    layer_in = x
    for layer, (w_ih, w_hh, b_ih, b_hh) in enumerate(params["lstm"]):
        H = w_hh.shape[-1]

        def step(carry, xt, w_ih=w_ih, w_hh=w_hh, b_ih=b_ih, b_hh=b_hh, H=H):
            h, c = carry
            g = xt @ w_ih.T + h @ w_hh.T + b_ih + b_hh
            i = jax.nn.sigmoid(g[:, 0 * H:1 * H])
            f = jax.nn.sigmoid(g[:, 1 * H:2 * H])
            gg = jnp.tanh(g[:, 2 * H:3 * H])
            o = jax.nn.sigmoid(g[:, 3 * H:4 * H])
            c_new = f * c + i * gg
            h_new = o * jnp.tanh(c_new)
            return (h_new, c_new), h_new

        (hT, cT), y = lax.scan(step, (h0_all[layer], c0_all[layer]), layer_in)
        layer_in = y
        hs.append(hT)
        cs.append(cT)
    out = layer_in @ params["lin_w"].T + params["lin_b"]
    return out, (jnp.stack(hs, 0), jnp.stack(cs, 0))


if __name__ == "__main__":
    vocab_size = 16
    num_hiddens = 32
    num_layers = 2
    batch = 2
    seq = 8

    key = jax.random.PRNGKey(0)
    k_param, k_tok = jax.random.split(key)
    params = init_params(k_param, vocab_size, num_hiddens, num_layers)
    prepped = prepare_params(params)   # one-time weight prep (not per forward)

    X = jax.random.randint(k_tok, (batch, seq), 0, vocab_size, dtype=jnp.int32)
    state0 = (jnp.zeros((num_layers, batch, num_hiddens), jnp.float32),
              jnp.zeros((num_layers, batch, num_hiddens), jnp.float32))

    out, (hT, cT) = my_lstm_forward(prepped, X, state0)
    out = jax.block_until_ready(out)
    hT = jax.block_until_ready(hT)
    cT = jax.block_until_ready(cT)

    out_ref, (hT_ref, cT_ref) = ref_forward(params, X, state0, vocab_size)
    assert out.shape == (seq, batch, vocab_size)
    assert hT.shape == (num_layers, batch, num_hiddens)
    assert cT.shape == (num_layers, batch, num_hiddens)
    assert jnp.allclose(out, out_ref, atol=1e-5, rtol=1e-5)
    assert jnp.allclose(hT, hT_ref, atol=1e-5, rtol=1e-5)
    assert jnp.allclose(cT, cT_ref, atol=1e-5, rtol=1e-5)

    print("KERNEL_OK")
</pallas_src>

<mosaic_0001>
module attributes {stable_mosaic.version = 11 : i64} {
  func.func @lstm_recurrent_kernel(%arg0: i32, %arg1: memref<8x4x2x32xf32, #tpu.memory_space<vmem>>, %arg2: memref<4x32x32xf32, #tpu.memory_space<vmem>>, %arg3: memref<2x32xf32, #tpu.memory_space<vmem>>, %arg4: memref<2x32xf32, #tpu.memory_space<vmem>>, %arg5: memref<8x2x32xf32, #tpu.memory_space<vmem>>, %arg6: memref<2x32xf32, #tpu.memory_space<vmem>>, %arg7: memref<2x32xf32, #tpu.memory_space<vmem>>, %arg8: memref<2x32xf32, #tpu.memory_space<vmem>>, %arg9: memref<2x32xf32, #tpu.memory_space<vmem>>) attributes {dimension_semantics = [#tpu.dimension_semantics<arbitrary>], iteration_bounds = array<i64: 1>, scalar_prefetch = 0 : i64, scratch_operands = 2 : i64, tpu.core_type = #tpu.core_type<tc>, window_params = [{transform_indices = @transform_0, window_bounds = array<i64: 8, 4, 2, 32>}, {pipeline_mode = #tpu.pipeline_mode<synchronous>, transform_indices = @transform_1, window_bounds = array<i64: 4, 32, 32>}, {pipeline_mode = #tpu.pipeline_mode<synchronous>, transform_indices = @transform_2, window_bounds = array<i64: 2, 32>}, {pipeline_mode = #tpu.pipeline_mode<synchronous>, transform_indices = @transform_3, window_bounds = array<i64: 2, 32>}, {transform_indices = @transform_4, window_bounds = array<i64: 8, 2, 32>}, {pipeline_mode = #tpu.pipeline_mode<synchronous>, transform_indices = @transform_5, window_bounds = array<i64: 2, 32>}, {pipeline_mode = #tpu.pipeline_mode<synchronous>, transform_indices = @transform_6, window_bounds = array<i64: 2, 32>}]} {
    %c0_i32 = arith.constant 0 : i32
    %0 = arith.cmpi eq, %arg0, %c0_i32 : i32
    %1 = arith.extui %0 : i1 to i32
    %c0_i32_0 = arith.constant 0 : i32
    %2 = arith.cmpi ne, %1, %c0_i32_0 : i32
    scf.if %2 {
      %c0_115 = arith.constant 0 : index
      %c0_116 = arith.constant 0 : index
      %370 = vector.load %arg3[%c0_115, %c0_116] : memref<2x32xf32, #tpu.memory_space<vmem>>, vector<2x32xf32>
      %c0_117 = arith.constant 0 : index
      %c0_118 = arith.constant 0 : index
      %371 = vector.load %arg8[%c0_117, %c0_118] : memref<2x32xf32, #tpu.memory_space<vmem>>, vector<2x32xf32>
      tpu.vector_store %arg8[%c0_117, %c0_118], %370 {strides = array<i32>} : memref<2x32xf32, #tpu.memory_space<vmem>>, vector<2x32xf32>,
      %c0_119 = arith.constant 0 : index
      %c0_120 = arith.constant 0 : index
      %372 = vector.load %arg4[%c0_119, %c0_120] : memref<2x32xf32, #tpu.memory_space<vmem>>, vector<2x32xf32>
      %c0_121 = arith.constant 0 : index
      %c0_122 = arith.constant 0 : index
      %373 = vector.load %arg9[%c0_121, %c0_122] : memref<2x32xf32, #tpu.memory_space<vmem>>, vector<2x32xf32>
      tpu.vector_store %arg9[%c0_121, %c0_122], %372 {strides = array<i32>} : memref<2x32xf32, #tpu.memory_space<vmem>>, vector<2x32xf32>,
    } else {
    }
    %c0 = arith.constant 0 : index
    %c0_1 = arith.constant 0 : index
    %c0_2 = arith.constant 0 : index
    %3 = vector.load %arg2[%c0, %c0_1, %c0_2] : memref<4x32x32xf32, #tpu.memory_space<vmem>>, vector<1x32x32xf32>
    %4 = vector.shape_cast %3 : vector<1x32x32xf32> to vector<32x32xf32>
    %c1 = arith.constant 1 : index
    %c0_3 = arith.constant 0 : index
    %c0_4 = arith.constant 0 : index
    %5 = vector.load %arg2[%c1, %c0_3, %c0_4] : memref<4x32x32xf32, #tpu.memory_space<vmem>>, vector<1x32x32xf32>
    %6 = vector.shape_cast %5 : vector<1x32x32xf32> to vector<32x32xf32>
    %c2 = arith.constant 2 : index
    %c0_5 = arith.constant 0 : index
    %c0_6 = arith.constant 0 : index
    %7 = vector.load %arg2[%c2, %c0_5, %c0_6] : memref<4x32x32xf32, #tpu.memory_space<vmem>>, vector<1x32x32xf32>
    %8 = vector.shape_cast %7 : vector<1x32x32xf32> to vector<32x32xf32>
    %c3 = arith.constant 3 : index
    %c0_7 = arith.constant 0 : index
    %c0_8 = arith.constant 0 : index
    %9 = vector.load %arg2[%c3, %c0_7, %c0_8] : memref<4x32x32xf32, #tpu.memory_space<vmem>>, vector<1x32x32xf32>
    %10 = vector.shape_cast %9 : vector<1x32x32xf32> to vector<32x32xf32>
    %c0_9 = arith.constant 0 : index
    %c0_10 = arith.constant 0 : index
    %11 = vector.load %arg8[%c0_9, %c0_10] : memref<2x32xf32, #tpu.memory_space<vmem>>, vector<2x32xf32>
    %c0_11 = arith.constant 0 : index
    %c0_12 = arith.constant 0 : index
    %12 = vector.load %arg9[%c0_11, %c0_12] : memref<2x32xf32, #tpu.memory_space<vmem>>, vector<2x32xf32>
    %c0_i32_13 = arith.constant 0 : i32
    %13 = arith.index_cast %c0_i32_13 : i32 to index
    %c0_14 = arith.constant 0 : index
    %c0_15 = arith.constant 0 : index
    %c0_16 = arith.constant 0 : index
    %14 = vector.load %arg1[%13, %c0_14, %c0_15, %c0_16] : memref<8x4x2x32xf32, #tpu.memory_space<vmem>>, vector<1x4x2x32xf32>
    %15 = vector.shape_cast %14 : vector<1x4x2x32xf32> to vector<4x2x32xf32>
    %16 = vector.extract_strided_slice %15 {offsets = [0, 0, 0], sizes = [1, 2, 32], strides = [1, 1, 1]} : vector<4x2x32xf32> to vector<1x2x32xf32>
    %17 = vector.shape_cast %16 : vector<1x2x32xf32> to vector<2x32xf32>
    %cst = arith.constant dense<0.000000e+00> : vector<2x32xf32>
    %18 = tpu.matmul %11, %4, %cst {dimension_numbers = #tpu.dot_dimension_numbers<[1], [0], [0], [1], [0, 0, 1, 1], [], []>} : vector<2x32xf32>, vector<32x32xf32>, vector<2x32xf32> -> vector<2x32xf32>
    %19 = arith.addf %17, %18 : vector<2x32xf32>
    %20 = vector.extract_strided_slice %15 {offsets = [1, 0, 0], sizes = [1, 2, 32], strides = [1, 1, 1]} : vector<4x2x32xf32> to vector<1x2x32xf32>
    %21 = vector.shape_cast %20 : vector<1x2x32xf32> to vector<2x32xf32>
    %cst_17 = arith.constant dense<0.000000e+00> : vector<2x32xf32>
    %22 = tpu.matmul %11, %6, %cst_17 {dimension_numbers = #tpu.dot_dimension_numbers<[1], [0], [0], [1], [0, 0, 1, 1], [], []>} : vector<2x32xf32>, vector<32x32xf32>, vector<2x32xf32> -> vector<2x32xf32>
    %23 = arith.addf %21, %22 : vector<2x32xf32>
    %24 = vector.extract_strided_slice %15 {offsets = [2, 0, 0], sizes = [1, 2, 32], strides = [1, 1, 1]} : vector<4x2x32xf32> to vector<1x2x32xf32>
    %25 = vector.shape_cast %24 : vector<1x2x32xf32> to vector<2x32xf32>
    %cst_18 = arith.constant dense<0.000000e+00> : vector<2x32xf32>
    %26 = tpu.matmul %11, %8, %cst_18 {dimension_numbers = #tpu.dot_dimension_numbers<[1], [0], [0], [1], [0, 0, 1, 1], [], []>} : vector<2x32xf32>, vector<32x32xf32>, vector<2x32xf32> -> vector<2x32xf32>
    %27 = arith.addf %25, %26 : vector<2x32xf32>
    %28 = vector.extract_strided_slice %15 {offsets = [3, 0, 0], sizes = [1, 2, 32], strides = [1, 1, 1]} : vector<4x2x32xf32> to vector<1x2x32xf32>
    %29 = vector.shape_cast %28 : vector<1x2x32xf32> to vector<2x32xf32>
    %cst_19 = arith.constant dense<0.000000e+00> : vector<2x32xf32>
    %30 = tpu.matmul %11, %10, %cst_19 {dimension_numbers = #tpu.dot_dimension_numbers<[1], [0], [0], [1], [0, 0, 1, 1], [], []>} : vector<2x32xf32>, vector<32x32xf32>, vector<2x32xf32> -> vector<2x32xf32>
    %31 = arith.addf %29, %30 : vector<2x32xf32>
    %32 = arith.negf %19 : vector<2x32xf32>
    %33 = math.exp %32 : vector<2x32xf32>
    %cst_20 = arith.constant 1.000000e+00 : f32
    %34 = vector.broadcast %cst_20 : f32 to vector<2x32xf32>
    %35 = arith.addf %34, %33 : vector<2x32xf32>
    %36 = arith.divf %34, %35 : vector<2x32xf32>
    %37 = arith.negf %23 : vector<2x32xf32>
    %38 = math.exp %37 : vector<2x32xf32>
    %cst_21 = arith.constant 1.000000e+00 : f32
    %39 = vector.broadcast %cst_21 : f32 to vector<2x32xf32>
    %40 = arith.addf %39, %38 : vector<2x32xf32>
    %41 = arith.divf %39, %40 : vector<2x32xf32>
    %42 = math.tanh %27 : vector<2x32xf32>
    %43 = arith.negf %31 : vector<2x32xf32>
    %44 = math.exp %43 : vector<2x32xf32>
    %cst_22 = arith.constant 1.000000e+00 : f32
    %45 = vector.broadcast %cst_22 : f32 to vector<2x32xf32>
    %46 = arith.addf %45, %44 : vector<2x32xf32>
    %47 = arith.divf %45, %46 : vector<2x32xf32>
    %48 = arith.mulf %41, %12 : vector<2x32xf32>
    %49 = arith.mulf %36, %42 : vector<2x32xf32>
    %50 = arith.addf %48, %49 : vector<2x32xf32>
    %51 = math.tanh %50 : vector<2x32xf32>
    %52 = arith.mulf %47, %51 : vector<2x32xf32>
    %53 = arith.index_cast %c0_i32_13 : i32 to index
    %c0_23 = arith.constant 0 : index
    %c0_24 = arith.constant 0 : index
    %54 = vector.load %arg5[%53, %c0_23, %c0_24] : memref<8x2x32xf32, #tpu.memory_space<vmem>>, vector<1x2x32xf32>
    %55 = vector.shape_cast %54 : vector<1x2x32xf32> to vector<2x32xf32>
    %56 = vector.shape_cast %52 : vector<2x32xf32> to vector<1x2x32xf32>
    tpu.vector_store %arg5[%53, %c0_23, %c0_24], %56 {strides = array<i32>} : memref<8x2x32xf32, #tpu.memory_space<vmem>>, vector<1x2x32xf32>,
    %c1_i32 = arith.constant 1 : i32
    %57 = arith.index_cast %c1_i32 : i32 to index
    %c0_25 = arith.constant 0 : index
    %c0_26 = arith.constant 0 : index
    %c0_27 = arith.constant 0 : index
    %58 = vector.load %arg1[%57, %c0_25, %c0_26, %c0_27] : memref<8x4x2x32xf32, #tpu.memory_space<vmem>>, vector<1x4x2x32xf32>
    %59 = vector.shape_cast %58 : vector<1x4x2x32xf32> to vector<4x2x32xf32>
    %60 = vector.extract_strided_slice %59 {offsets = [0, 0, 0], sizes = [1, 2, 32], strides = [1, 1, 1]} : vector<4x2x32xf32> to vector<1x2x32xf32>
    %61 = vector.shape_cast %60 : vector<1x2x32xf32> to vector<2x32xf32>
    %cst_28 = arith.constant dense<0.000000e+00> : vector<2x32xf32>
    %62 = tpu.matmul %52, %4, %cst_28 {dimension_numbers = #tpu.dot_dimension_numbers<[1], [0], [0], [1], [0, 0, 1, 1], [], []>} : vector<2x32xf32>, vector<32x32xf32>, vector<2x32xf32> -> vector<2x32xf32>
    %63 = arith.addf %61, %62 : vector<2x32xf32>
    %64 = vector.extract_strided_slice %59 {offsets = [1, 0, 0], sizes = [1, 2, 32], strides = [1, 1, 1]} : vector<4x2x32xf32> to vector<1x2x32xf32>
    %65 = vector.shape_cast %64 : vector<1x2x32xf32> to vector<2x32xf32>
    %cst_29 = arith.constant dense<0.000000e+00> : vector<2x32xf32>
    %66 = tpu.matmul %52, %6, %cst_29 {dimension_numbers = #tpu.dot_dimension_numbers<[1], [0], [0], [1], [0, 0, 1, 1], [], []>} : vector<2x32xf32>, vector<32x32xf32>, vector<2x32xf32> -> vector<2x32xf32>
    %67 = arith.addf %65, %66 : vector<2x32xf32>
    %68 = vector.extract_strided_slice %59 {offsets = [2, 0, 0], sizes = [1, 2, 32], strides = [1, 1, 1]} : vector<4x2x32xf32> to vector<1x2x32xf32>
    %69 = vector.shape_cast %68 : vector<1x2x32xf32> to vector<2x32xf32>
    %cst_30 = arith.constant dense<0.000000e+00> : vector<2x32xf32>
    %70 = tpu.matmul %52, %8, %cst_30 {dimension_numbers = #tpu.dot_dimension_numbers<[1], [0], [0], [1], [0, 0, 1, 1], [], []>} : vector<2x32xf32>, vector<32x32xf32>, vector<2x32xf32> -> vector<2x32xf32>
    %71 = arith.addf %69, %70 : vector<2x32xf32>
    %72 = vector.extract_strided_slice %59 {offsets = [3, 0, 0], sizes = [1, 2, 32], strides = [1, 1, 1]} : vector<4x2x32xf32> to vector<1x2x32xf32>
    %73 = vector.shape_cast %72 : vector<1x2x32xf32> to vector<2x32xf32>
    %cst_31 = arith.constant dense<0.000000e+00> : vector<2x32xf32>
    %74 = tpu.matmul %52, %10, %cst_31 {dimension_numbers = #tpu.dot_dimension_numbers<[1], [0], [0], [1], [0, 0, 1, 1], [], []>} : vector<2x32xf32>, vector<32x32xf32>, vector<2x32xf32> -> vector<2x32xf32>
    %75 = arith.addf %73, %74 : vector<2x32xf32>
    %76 = arith.negf %63 : vector<2x32xf32>
    %77 = math.exp %76 : vector<2x32xf32>
    %cst_32 = arith.constant 1.000000e+00 : f32
    %78 = vector.broadcast %cst_32 : f32 to vector<2x32xf32>
    %79 = arith.addf %78, %77 : vector<2x32xf32>
    %80 = arith.divf %78, %79 : vector<2x32xf32>
    %81 = arith.negf %67 : vector<2x32xf32>
    %82 = math.exp %81 : vector<2x32xf32>
    %cst_33 = arith.constant 1.000000e+00 : f32
    %83 = vector.broadcast %cst_33 : f32 to vector<2x32xf32>
    %84 = arith.addf %83, %82 : vector<2x32xf32>
    %85 = arith.divf %83, %84 : vector<2x32xf32>
    %86 = math.tanh %71 : vector<2x32xf32>
    %87 = arith.negf %75 : vector<2x32xf32>
    %88 = math.exp %87 : vector<2x32xf32>
    %cst_34 = arith.constant 1.000000e+00 : f32
    %89 = vector.broadcast %cst_34 : f32 to vector<2x32xf32>
    %90 = arith.addf %89, %88 : vector<2x32xf32>
    %91 = arith.divf %89, %90 : vector<2x32xf32>
    %92 = arith.mulf %85, %50 : vector<2x32xf32>
    %93 = arith.mulf %80, %86 : vector<2x32xf32>
    %94 = arith.addf %92, %93 : vector<2x32xf32>
    %95 = math.tanh %94 : vector<2x32xf32>
    %96 = arith.mulf %91, %95 : vector<2x32xf32>
    %97 = arith.index_cast %c1_i32 : i32 to index
    %c0_35 = arith.constant 0 : index
    %c0_36 = arith.constant 0 : index
    %98 = vector.load %arg5[%97, %c0_35, %c0_36] : memref<8x2x32xf32, #tpu.memory_space<vmem>>, vector<1x2x32xf32>
    %99 = vector.shape_cast %98 : vector<1x2x32xf32> to vector<2x32xf32>
    %100 = vector.shape_cast %96 : vector<2x32xf32> to vector<1x2x32xf32>
    tpu.vector_store %arg5[%97, %c0_35, %c0_36], %100 {strides = array<i32>} : memref<8x2x32xf32, #tpu.memory_space<vmem>>, vector<1x2x32xf32>,
    %c2_i32 = arith.constant 2 : i32
    %101 = arith.index_cast %c2_i32 : i32 to index
    %c0_37 = arith.constant 0 : index
    %c0_38 = arith.constant 0 : index
    %c0_39 = arith.constant 0 : index
    %102 = vector.load %arg1[%101, %c0_37, %c0_38, %c0_39] : memref<8x4x2x32xf32, #tpu.memory_space<vmem>>, vector<1x4x2x32xf32>
    %103 = vector.shape_cast %102 : vector<1x4x2x32xf32> to vector<4x2x32xf32>
    %104 = vector.extract_strided_slice %103 {offsets = [0, 0, 0], sizes = [1, 2, 32], strides = [1, 1, 1]} : vector<4x2x32xf32> to vector<1x2x32xf32>
    %105 = vector.shape_cast %104 : vector<1x2x32xf32> to vector<2x32xf32>
    %cst_40 = arith.constant dense<0.000000e+00> : vector<2x32xf32>
    %106 = tpu.matmul %96, %4, %cst_40 {dimension_numbers = #tpu.dot_dimension_numbers<[1], [0], [0], [1], [0, 0, 1, 1], [], []>} : vector<2x32xf32>, vector<32x32xf32>, vector<2x32xf32> -> vector<2x32xf32>
    %107 = arith.addf %105, %106 : vector<2x32xf32>
    %108 = vector.extract_strided_slice %103 {offsets = [1, 0, 0], sizes = [1, 2, 32], strides = [1, 1, 1]} : vector<4x2x32xf32> to vector<1x2x32xf32>
    %109 = vector.shape_cast %108 : vector<1x2x32xf32> to vector<2x32xf32>
    %cst_41 = arith.constant dense<0.000000e+00> : vector<2x32xf32>
    %110 = tpu.matmul %96, %6, %cst_41 {dimension_numbers = #tpu.dot_dimension_numbers<[1], [0], [0], [1], [0, 0, 1, 1], [], []>} : vector<2x32xf32>, vector<32x32xf32>, vector<2x32xf32> -> vector<2x32xf32>
    %111 = arith.addf %109, %110 : vector<2x32xf32>
    %112 = vector.extract_strided_slice %103 {offsets = [2, 0, 0], sizes = [1, 2, 32], strides = [1, 1, 1]} : vector<4x2x32xf32> to vector<1x2x32xf32>
    %113 = vector.shape_cast %112 : vector<1x2x32xf32> to vector<2x32xf32>
    %cst_42 = arith.constant dense<0.000000e+00> : vector<2x32xf32>
    %114 = tpu.matmul %96, %8, %cst_42 {dimension_numbers = #tpu.dot_dimension_numbers<[1], [0], [0], [1], [0, 0, 1, 1], [], []>} : vector<2x32xf32>, vector<32x32xf32>, vector<2x32xf32> -> vector<2x32xf32>
    %115 = arith.addf %113, %114 : vector<2x32xf32>
    %116 = vector.extract_strided_slice %103 {offsets = [3, 0, 0], sizes = [1, 2, 32], strides = [1, 1, 1]} : vector<4x2x32xf32> to vector<1x2x32xf32>
    %117 = vector.shape_cast %116 : vector<1x2x32xf32> to vector<2x32xf32>
    %cst_43 = arith.constant dense<0.000000e+00> : vector<2x32xf32>
    %118 = tpu.matmul %96, %10, %cst_43 {dimension_numbers = #tpu.dot_dimension_numbers<[1], [0], [0], [1], [0, 0, 1, 1], [], []>} : vector<2x32xf32>, vector<32x32xf32>, vector<2x32xf32> -> vector<2x32xf32>
    %119 = arith.addf %117, %118 : vector<2x32xf32>
    %120 = arith.negf %107 : vector<2x32xf32>
    %121 = math.exp %120 : vector<2x32xf32>
    %cst_44 = arith.constant 1.000000e+00 : f32
    %122 = vector.broadcast %cst_44 : f32 to vector<2x32xf32>
    %123 = arith.addf %122, %121 : vector<2x32xf32>
    %124 = arith.divf %122, %123 : vector<2x32xf32>
    %125 = arith.negf %111 : vector<2x32xf32>
    %126 = math.exp %125 : vector<2x32xf32>
    %cst_45 = arith.constant 1.000000e+00 : f32
    %127 = vector.broadcast %cst_45 : f32 to vector<2x32xf32>
    %128 = arith.addf %127, %126 : vector<2x32xf32>
    %129 = arith.divf %127, %128 : vector<2x32xf32>
    %130 = math.tanh %115 : vector<2x32xf32>
    %131 = arith.negf %119 : vector<2x32xf32>
    %132 = math.exp %131 : vector<2x32xf32>
    %cst_46 = arith.constant 1.000000e+00 : f32
    %133 = vector.broadcast %cst_46 : f32 to vector<2x32xf32>
    %134 = arith.addf %133, %132 : vector<2x32xf32>
    %135 = arith.divf %133, %134 : vector<2x32xf32>
    %136 = arith.mulf %129, %94 : vector<2x32xf32>
    %137 = arith.mulf %124, %130 : vector<2x32xf32>
    %138 = arith.addf %136, %137 : vector<2x32xf32>
    %139 = math.tanh %138 : vector<2x32xf32>
    %140 = arith.mulf %135, %139 : vector<2x32xf32>
    %141 = arith.index_cast %c2_i32 : i32 to index
    %c0_47 = arith.constant 0 : index
    %c0_48 = arith.constant 0 : index
    %142 = vector.load %arg5[%141, %c0_47, %c0_48] : memref<8x2x32xf32, #tpu.memory_space<vmem>>, vector<1x2x32xf32>
    %143 = vector.shape_cast %142 : vector<1x2x32xf32> to vector<2x32xf32>
    %144 = vector.shape_cast %140 : vector<2x32xf32> to vector<1x2x32xf32>
    tpu.vector_store %arg5[%141, %c0_47, %c0_48], %144 {strides = array<i32>} : memref<8x2x32xf32, #tpu.memory_space<vmem>>, vector<1x2x32xf32>,
    %c3_i32 = arith.constant 3 : i32
    %145 = arith.index_cast %c3_i32 : i32 to index
    %c0_49 = arith.constant 0 : index
    %c0_50 = arith.constant 0 : index
    %c0_51 = arith.constant 0 : index
    %146 = vector.load %arg1[%145, %c0_49, %c0_50, %c0_51] : memref<8x4x2x32xf32, #tpu.memory_space<vmem>>, vector<1x4x2x32xf32>
    %147 = vector.shape_cast %146 : vector<1x4x2x32xf32> to vector<4x2x32xf32>
    %148 = vector.extract_strided_slice %147 {offsets = [0, 0, 0], sizes = [1, 2, 32], strides = [1, 1, 1]} : vector<4x2x32xf32> to vector<1x2x32xf32>
    %149 = vector.shape_cast %148 : vector<1x2x32xf32> to vector<2x32xf32>
    %cst_52 = arith.constant dense<0.000000e+00> : vector<2x32xf32>
    %150 = tpu.matmul %140, %4, %cst_52 {dimension_numbers = #tpu.dot_dimension_numbers<[1], [0], [0], [1], [0, 0, 1, 1], [], []>} : vector<2x32xf32>, vector<32x32xf32>, vector<2x32xf32> -> vector<2x32xf32>
    %151 = arith.addf %149, %150 : vector<2x32xf32>
    %152 = vector.extract_strided_slice %147 {offsets = [1, 0, 0], sizes = [1, 2, 32], strides = [1, 1, 1]} : vector<4x2x32xf32> to vector<1x2x32xf32>
    %153 = vector.shape_cast %152 : vector<1x2x32xf32> to vector<2x32xf32>
    %cst_53 = arith.constant dense<0.000000e+00> : vector<2x32xf32>
    %154 = tpu.matmul %140, %6, %cst_53 {dimension_numbers = #tpu.dot_dimension_numbers<[1], [0], [0], [1], [0, 0, 1, 1], [], []>} : vector<2x32xf32>, vector<32x32xf32>, vector<2x32xf32> -> vector<2x32xf32>
    %155 = arith.addf %153, %154 : vector<2x32xf32>
    %156 = vector.extract_strided_slice %147 {offsets = [2, 0, 0], sizes = [1, 2, 32], strides = [1, 1, 1]} : vector<4x2x32xf32> to vector<1x2x32xf32>
    %157 = vector.shape_cast %156 : vector<1x2x32xf32> to vector<2x32xf32>
    %cst_54 = arith.constant dense<0.000000e+00> : vector<2x32xf32>
    %158 = tpu.matmul %140, %8, %cst_54 {dimension_numbers = #tpu.dot_dimension_numbers<[1], [0], [0], [1], [0, 0, 1, 1], [], []>} : vector<2x32xf32>, vector<32x32xf32>, vector<2x32xf32> -> vector<2x32xf32>
    %159 = arith.addf %157, %158 : vector<2x32xf32>
    %160 = vector.extract_strided_slice %147 {offsets = [3, 0, 0], sizes = [1, 2, 32], strides = [1, 1, 1]} : vector<4x2x32xf32> to vector<1x2x32xf32>
    %161 = vector.shape_cast %160 : vector<1x2x32xf32> to vector<2x32xf32>
    %cst_55 = arith.constant dense<0.000000e+00> : vector<2x32xf32>
    %162 = tpu.matmul %140, %10, %cst_55 {dimension_numbers = #tpu.dot_dimension_numbers<[1], [0], [0], [1], [0, 0, 1, 1], [], []>} : vector<2x32xf32>, vector<32x32xf32>, vector<2x32xf32> -> vector<2x32xf32>
    %163 = arith.addf %161, %162 : vector<2x32xf32>
    %164 = arith.negf %151 : vector<2x32xf32>
    %165 = math.exp %164 : vector<2x32xf32>
    %cst_56 = arith.constant 1.000000e+00 : f32
    %166 = vector.broadcast %cst_56 : f32 to vector<2x32xf32>
    %167 = arith.addf %166, %165 : vector<2x32xf32>
    %168 = arith.divf %166, %167 : vector<2x32xf32>
    %169 = arith.negf %155 : vector<2x32xf32>
    %170 = math.exp %169 : vector<2x32xf32>
    %cst_57 = arith.constant 1.000000e+00 : f32
    %171 = vector.broadcast %cst_57 : f32 to vector<2x32xf32>
    %172 = arith.addf %171, %170 : vector<2x32xf32>
    %173 = arith.divf %171, %172 : vector<2x32xf32>
    %174 = math.tanh %159 : vector<2x32xf32>
    %175 = arith.negf %163 : vector<2x32xf32>
    %176 = math.exp %175 : vector<2x32xf32>
    %cst_58 = arith.constant 1.000000e+00 : f32
    %177 = vector.broadcast %cst_58 : f32 to vector<2x32xf32>
    %178 = arith.addf %177, %176 : vector<2x32xf32>
    %179 = arith.divf %177, %178 : vector<2x32xf32>
    %180 = arith.mulf %173, %138 : vector<2x32xf32>
    %181 = arith.mulf %168, %174 : vector<2x32xf32>
    %182 = arith.addf %180, %181 : vector<2x32xf32>
    %183 = math.tanh %182 : vector<2x32xf32>
    %184 = arith.mulf %179, %183 : vector<2x32xf32>
    %185 = arith.index_cast %c3_i32 : i32 to index
    %c0_59 = arith.constant 0 : index
    %c0_60 = arith.constant 0 : index
    %186 = vector.load %arg5[%185, %c0_59, %c0_60] : memref<8x2x32xf32, #tpu.memory_space<vmem>>, vector<1x2x32xf32>
    %187 = vector.shape_cast %186 : vector<1x2x32xf32> to vector<2x32xf32>
    %188 = vector.shape_cast %184 : vector<2x32xf32> to vector<1x2x32xf32>
    tpu.vector_store %arg5[%185, %c0_59, %c0_60], %188 {strides = array<i32>} : memref<8x2x32xf32, #tpu.memory_space<vmem>>, vector<1x2x32xf32>,
    %c4_i32 = arith.constant 4 : i32
    %189 = arith.index_cast %c4_i32 : i32 to index
    %c0_61 = arith.constant 0 : index
    %c0_62 = arith.constant 0 : index
    %c0_63 = arith.constant 0 : index
    %190 = vector.load %arg1[%189, %c0_61, %c0_62, %c0_63] : memref<8x4x2x32xf32, #tpu.memory_space<vmem>>, vector<1x4x2x32xf32>
    %191 = vector.shape_cast %190 : vector<1x4x2x32xf32> to vector<4x2x32xf32>
    %192 = vector.extract_strided_slice %191 {offsets = [0, 0, 0], sizes = [1, 2, 32], strides = [1, 1, 1]} : vector<4x2x32xf32> to vector<1x2x32xf32>
    %193 = vector.shape_cast %192 : vector<1x2x32xf32> to vector<2x32xf32>
    %cst_64 = arith.constant dense<0.000000e+00> : vector<2x32xf32>
    %194 = tpu.matmul %184, %4, %cst_64 {dimension_numbers = #tpu.dot_dimension_numbers<[1], [0], [0], [1], [0, 0, 1, 1], [], []>} : vector<2x32xf32>, vector<32x32xf32>, vector<2x32xf32> -> vector<2x32xf32>
    %195 = arith.addf %193, %194 : vector<2x32xf32>
    %196 = vector.extract_strided_slice %191 {offsets = [1, 0, 0], sizes = [1, 2, 32], strides = [1, 1, 1]} : vector<4x2x32xf32> to vector<1x2x32xf32>
    %197 = vector.shape_cast %196 : vector<1x2x32xf32> to vector<2x32xf32>
    %cst_65 = arith.constant dense<0.000000e+00> : vector<2x32xf32>
    %198 = tpu.matmul %184, %6, %cst_65 {dimension_numbers = #tpu.dot_dimension_numbers<[1], [0], [0], [1], [0, 0, 1, 1], [], []>} : vector<2x32xf32>, vector<32x32xf32>, vector<2x32xf32> -> vector<2x32xf32>
    %199 = arith.addf %197, %198 : vector<2x32xf32>
    %200 = vector.extract_strided_slice %191 {offsets = [2, 0, 0], sizes = [1, 2, 32], strides = [1, 1, 1]} : vector<4x2x32xf32> to vector<1x2x32xf32>
    %201 = vector.shape_cast %200 : vector<1x2x32xf32> to vector<2x32xf32>
    %cst_66 = arith.constant dense<0.000000e+00> : vector<2x32xf32>
    %202 = tpu.matmul %184, %8, %cst_66 {dimension_numbers = #tpu.dot_dimension_numbers<[1], [0], [0], [1], [0, 0, 1, 1], [], []>} : vector<2x32xf32>, vector<32x32xf32>, vector<2x32xf32> -> vector<2x32xf32>
    %203 = arith.addf %201, %202 : vector<2x32xf32>
    %204 = vector.extract_strided_slice %191 {offsets = [3, 0, 0], sizes = [1, 2, 32], strides = [1, 1, 1]} : vector<4x2x32xf32> to vector<1x2x32xf32>
    %205 = vector.shape_cast %204 : vector<1x2x32xf32> to vector<2x32xf32>
    %cst_67 = arith.constant dense<0.000000e+00> : vector<2x32xf32>
    %206 = tpu.matmul %184, %10, %cst_67 {dimension_numbers = #tpu.dot_dimension_numbers<[1], [0], [0], [1], [0, 0, 1, 1], [], []>} : vector<2x32xf32>, vector<32x32xf32>, vector<2x32xf32> -> vector<2x32xf32>
    %207 = arith.addf %205, %206 : vector<2x32xf32>
    %208 = arith.negf %195 : vector<2x32xf32>
    %209 = math.exp %208 : vector<2x32xf32>
    %cst_68 = arith.constant 1.000000e+00 : f32
    %210 = vector.broadcast %cst_68 : f32 to vector<2x32xf32>
    %211 = arith.addf %210, %209 : vector<2x32xf32>
    %212 = arith.divf %210, %211 : vector<2x32xf32>
    %213 = arith.negf %199 : vector<2x32xf32>
    %214 = math.exp %213 : vector<2x32xf32>
    %cst_69 = arith.constant 1.000000e+00 : f32
    %215 = vector.broadcast %cst_69 : f32 to vector<2x32xf32>
    %216 = arith.addf %215, %214 : vector<2x32xf32>
    %217 = arith.divf %215, %216 : vector<2x32xf32>
    %218 = math.tanh %203 : vector<2x32xf32>
    %219 = arith.negf %207 : vector<2x32xf32>
    %220 = math.exp %219 : vector<2x32xf32>
    %cst_70 = arith.constant 1.000000e+00 : f32
    %221 = vector.broadcast %cst_70 : f32 to vector<2x32xf32>
    %222 = arith.addf %221, %220 : vector<2x32xf32>
    %223 = arith.divf %221, %222 : vector<2x32xf32>
    %224 = arith.mulf %217, %182 : vector<2x32xf32>
    %225 = arith.mulf %212, %218 : vector<2x32xf32>
    %226 = arith.addf %224, %225 : vector<2x32xf32>
    %227 = math.tanh %226 : vector<2x32xf32>
    %228 = arith.mulf %223, %227 : vector<2x32xf32>
    %229 = arith.index_cast %c4_i32 : i32 to index
    %c0_71 = arith.constant 0 : index
    %c0_72 = arith.constant 0 : index
    %230 = vector.load %arg5[%229, %c0_71, %c0_72] : memref<8x2x32xf32, #tpu.memory_space<vmem>>, vector<1x2x32xf32>
    %231 = vector.shape_cast %230 : vector<1x2x32xf32> to vector<2x32xf32>
    %232 = vector.shape_cast %228 : vector<2x32xf32> to vector<1x2x32xf32>
    tpu.vector_store %arg5[%229, %c0_71, %c0_72], %232 {strides = array<i32>} : memref<8x2x32xf32, #tpu.memory_space<vmem>>, vector<1x2x32xf32>,
    %c5_i32 = arith.constant 5 : i32
    %233 = arith.index_cast %c5_i32 : i32 to index
    %c0_73 = arith.constant 0 : index
    %c0_74 = arith.constant 0 : index
    %c0_75 = arith.constant 0 : index
    %234 = vector.load %arg1[%233, %c0_73, %c0_74, %c0_75] : memref<8x4x2x32xf32, #tpu.memory_space<vmem>>, vector<1x4x2x32xf32>
    %235 = vector.shape_cast %234 : vector<1x4x2x32xf32> to vector<4x2x32xf32>
    %236 = vector.extract_strided_slice %235 {offsets = [0, 0, 0], sizes = [1, 2, 32], strides = [1, 1, 1]} : vector<4x2x32xf32> to vector<1x2x32xf32>
    %237 = vector.shape_cast %236 : vector<1x2x32xf32> to vector<2x32xf32>
    %cst_76 = arith.constant dense<0.000000e+00> : vector<2x32xf32>
    %238 = tpu.matmul %228, %4, %cst_76 {dimension_numbers = #tpu.dot_dimension_numbers<[1], [0], [0], [1], [0, 0, 1, 1], [], []>} : vector<2x32xf32>, vector<32x32xf32>, vector<2x32xf32> -> vector<2x32xf32>
    %239 = arith.addf %237, %238 : vector<2x32xf32>
    %240 = vector.extract_strided_slice %235 {offsets = [1, 0, 0], sizes = [1, 2, 32], strides = [1, 1, 1]} : vector<4x2x32xf32> to vector<1x2x32xf32>
    %241 = vector.shape_cast %240 : vector<1x2x32xf32> to vector<2x32xf32>
    %cst_77 = arith.constant dense<0.000000e+00> : vector<2x32xf32>
    %242 = tpu.matmul %228, %6, %cst_77 {dimension_numbers = #tpu.dot_dimension_numbers<[1], [0], [0], [1], [0, 0, 1, 1], [], []>} : vector<2x32xf32>, vector<32x32xf32>, vector<2x32xf32> -> vector<2x32xf32>
    %243 = arith.addf %241, %242 : vector<2x32xf32>
    %244 = vector.extract_strided_slice %235 {offsets = [2, 0, 0], sizes = [1, 2, 32], strides = [1, 1, 1]} : vector<4x2x32xf32> to vector<1x2x32xf32>
    %245 = vector.shape_cast %244 : vector<1x2x32xf32> to vector<2x32xf32>
    %cst_78 = arith.constant dense<0.000000e+00> : vector<2x32xf32>
    %246 = tpu.matmul %228, %8, %cst_78 {dimension_numbers = #tpu.dot_dimension_numbers<[1], [0], [0], [1], [0, 0, 1, 1], [], []>} : vector<2x32xf32>, vector<32x32xf32>, vector<2x32xf32> -> vector<2x32xf32>
    %247 = arith.addf %245, %246 : vector<2x32xf32>
    %248 = vector.extract_strided_slice %235 {offsets = [3, 0, 0], sizes = [1, 2, 32], strides = [1, 1, 1]} : vector<4x2x32xf32> to vector<1x2x32xf32>
    %249 = vector.shape_cast %248 : vector<1x2x32xf32> to vector<2x32xf32>
    %cst_79 = arith.constant dense<0.000000e+00> : vector<2x32xf32>
    %250 = tpu.matmul %228, %10, %cst_79 {dimension_numbers = #tpu.dot_dimension_numbers<[1], [0], [0], [1], [0, 0, 1, 1], [], []>} : vector<2x32xf32>, vector<32x32xf32>, vector<2x32xf32> -> vector<2x32xf32>
    %251 = arith.addf %249, %250 : vector<2x32xf32>
    %252 = arith.negf %239 : vector<2x32xf32>
    %253 = math.exp %252 : vector<2x32xf32>
    %cst_80 = arith.constant 1.000000e+00 : f32
    %254 = vector.broadcast %cst_80 : f32 to vector<2x32xf32>
    %255 = arith.addf %254, %253 : vector<2x32xf32>
    %256 = arith.divf %254, %255 : vector<2x32xf32>
    %257 = arith.negf %243 : vector<2x32xf32>
    %258 = math.exp %257 : vector<2x32xf32>
    %cst_81 = arith.constant 1.000000e+00 : f32
    %259 = vector.broadcast %cst_81 : f32 to vector<2x32xf32>
    %260 = arith.addf %259, %258 : vector<2x32xf32>
    %261 = arith.divf %259, %260 : vector<2x32xf32>
    %262 = math.tanh %247 : vector<2x32xf32>
    %263 = arith.negf %251 : vector<2x32xf32>
    %264 = math.exp %263 : vector<2x32xf32>
    %cst_82 = arith.constant 1.000000e+00 : f32
    %265 = vector.broadcast %cst_82 : f32 to vector<2x32xf32>
    %266 = arith.addf %265, %264 : vector<2x32xf32>
    %267 = arith.divf %265, %266 : vector<2x32xf32>
    %268 = arith.mulf %261, %226 : vector<2x32xf32>
    %269 = arith.mulf %256, %262 : vector<2x32xf32>
    %270 = arith.addf %268, %269 : vector<2x32xf32>
    %271 = math.tanh %270 : vector<2x32xf32>
    %272 = arith.mulf %267, %271 : vector<2x32xf32>
    %273 = arith.index_cast %c5_i32 : i32 to index
    %c0_83 = arith.constant 0 : index
    %c0_84 = arith.constant 0 : index
    %274 = vector.load %arg5[%273, %c0_83, %c0_84] : memref<8x2x32xf32, #tpu.memory_space<vmem>>, vector<1x2x32xf32>
    %275 = vector.shape_cast %274 : vector<1x2x32xf32> to vector<2x32xf32>
    %276 = vector.shape_cast %272 : vector<2x32xf32> to vector<1x2x32xf32>
    tpu.vector_store %arg5[%273, %c0_83, %c0_84], %276 {strides = array<i32>} : memref<8x2x32xf32, #tpu.memory_space<vmem>>, vector<1x2x32xf32>,
    %c6_i32 = arith.constant 6 : i32
    %277 = arith.index_cast %c6_i32 : i32 to index
    %c0_85 = arith.constant 0 : index
    %c0_86 = arith.constant 0 : index
    %c0_87 = arith.constant 0 : index
    %278 = vector.load %arg1[%277, %c0_85, %c0_86, %c0_87] : memref<8x4x2x32xf32, #tpu.memory_space<vmem>>, vector<1x4x2x32xf32>
    %279 = vector.shape_cast %278 : vector<1x4x2x32xf32> to vector<4x2x32xf32>
    %280 = vector.extract_strided_slice %279 {offsets = [0, 0, 0], sizes = [1, 2, 32], strides = [1, 1, 1]} : vector<4x2x32xf32> to vector<1x2x32xf32>
    %281 = vector.shape_cast %280 : vector<1x2x32xf32> to vector<2x32xf32>
    %cst_88 = arith.constant dense<0.000000e+00> : vector<2x32xf32>
    %282 = tpu.matmul %272, %4, %cst_88 {dimension_numbers = #tpu.dot_dimension_numbers<[1], [0], [0], [1], [0, 0, 1, 1], [], []>} : vector<2x32xf32>, vector<32x32xf32>, vector<2x32xf32> -> vector<2x32xf32>
    %283 = arith.addf %281, %282 : vector<2x32xf32>
    %284 = vector.extract_strided_slice %279 {offsets = [1, 0, 0], sizes = [1, 2, 32], strides = [1, 1, 1]} : vector<4x2x32xf32> to vector<1x2x32xf32>
    %285 = vector.shape_cast %284 : vector<1x2x32xf32> to vector<2x32xf32>
    %cst_89 = arith.constant dense<0.000000e+00> : vector<2x32xf32>
    %286 = tpu.matmul %272, %6, %cst_89 {dimension_numbers = #tpu.dot_dimension_numbers<[1], [0], [0], [1], [0, 0, 1, 1], [], []>} : vector<2x32xf32>, vector<32x32xf32>, vector<2x32xf32> -> vector<2x32xf32>
    %287 = arith.addf %285, %286 : vector<2x32xf32>
    %288 = vector.extract_strided_slice %279 {offsets = [2, 0, 0], sizes = [1, 2, 32], strides = [1, 1, 1]} : vector<4x2x32xf32> to vector<1x2x32xf32>
    %289 = vector.shape_cast %288 : vector<1x2x32xf32> to vector<2x32xf32>
    %cst_90 = arith.constant dense<0.000000e+00> : vector<2x32xf32>
    %290 = tpu.matmul %272, %8, %cst_90 {dimension_numbers = #tpu.dot_dimension_numbers<[1], [0], [0], [1], [0, 0, 1, 1], [], []>} : vector<2x32xf32>, vector<32x32xf32>, vector<2x32xf32> -> vector<2x32xf32>
    %291 = arith.addf %289, %290 : vector<2x32xf32>
    %292 = vector.extract_strided_slice %279 {offsets = [3, 0, 0], sizes = [1, 2, 32], strides = [1, 1, 1]} : vector<4x2x32xf32> to vector<1x2x32xf32>
    %293 = vector.shape_cast %292 : vector<1x2x32xf32> to vector<2x32xf32>
    %cst_91 = arith.constant dense<0.000000e+00> : vector<2x32xf32>
    %294 = tpu.matmul %272, %10, %cst_91 {dimension_numbers = #tpu.dot_dimension_numbers<[1], [0], [0], [1], [0, 0, 1, 1], [], []>} : vector<2x32xf32>, vector<32x32xf32>, vector<2x32xf32> -> vector<2x32xf32>
    %295 = arith.addf %293, %294 : vector<2x32xf32>
    %296 = arith.negf %283 : vector<2x32xf32>
    %297 = math.exp %296 : vector<2x32xf32>
    %cst_92 = arith.constant 1.000000e+00 : f32
    %298 = vector.broadcast %cst_92 : f32 to vector<2x32xf32>
    %299 = arith.addf %298, %297 : vector<2x32xf32>
    %300 = arith.divf %298, %299 : vector<2x32xf32>
    %301 = arith.negf %287 : vector<2x32xf32>
    %302 = math.exp %301 : vector<2x32xf32>
    %cst_93 = arith.constant 1.000000e+00 : f32
    %303 = vector.broadcast %cst_93 : f32 to vector<2x32xf32>
    %304 = arith.addf %303, %302 : vector<2x32xf32>
    %305 = arith.divf %303, %304 : vector<2x32xf32>
    %306 = math.tanh %291 : vector<2x32xf32>
    %307 = arith.negf %295 : vector<2x32xf32>
    %308 = math.exp %307 : vector<2x32xf32>
    %cst_94 = arith.constant 1.000000e+00 : f32
    %309 = vector.broadcast %cst_94 : f32 to vector<2x32xf32>
    %310 = arith.addf %309, %308 : vector<2x32xf32>
    %311 = arith.divf %309, %310 : vector<2x32xf32>
    %312 = arith.mulf %305, %270 : vector<2x32xf32>
    %313 = arith.mulf %300, %306 : vector<2x32xf32>
    %314 = arith.addf %312, %313 : vector<2x32xf32>
    %315 = math.tanh %314 : vector<2x32xf32>
    %316 = arith.mulf %311, %315 : vector<2x32xf32>
    %317 = arith.index_cast %c6_i32 : i32 to index
    %c0_95 = arith.constant 0 : index
    %c0_96 = arith.constant 0 : index
    %318 = vector.load %arg5[%317, %c0_95, %c0_96] : memref<8x2x32xf32, #tpu.memory_space<vmem>>, vector<1x2x32xf32>
    %319 = vector.shape_cast %318 : vector<1x2x32xf32> to vector<2x32xf32>
    %320 = vector.shape_cast %316 : vector<2x32xf32> to vector<1x2x32xf32>
    tpu.vector_store %arg5[%317, %c0_95, %c0_96], %320 {strides = array<i32>} : memref<8x2x32xf32, #tpu.memory_space<vmem>>, vector<1x2x32xf32>,
    %c7_i32 = arith.constant 7 : i32
    %321 = arith.index_cast %c7_i32 : i32 to index
    %c0_97 = arith.constant 0 : index
    %c0_98 = arith.constant 0 : index
    %c0_99 = arith.constant 0 : index
    %322 = vector.load %arg1[%321, %c0_97, %c0_98, %c0_99] : memref<8x4x2x32xf32, #tpu.memory_space<vmem>>, vector<1x4x2x32xf32>
    %323 = vector.shape_cast %322 : vector<1x4x2x32xf32> to vector<4x2x32xf32>
    %324 = vector.extract_strided_slice %323 {offsets = [0, 0, 0], sizes = [1, 2, 32], strides = [1, 1, 1]} : vector<4x2x32xf32> to vector<1x2x32xf32>
    %325 = vector.shape_cast %324 : vector<1x2x32xf32> to vector<2x32xf32>
    %cst_100 = arith.constant dense<0.000000e+00> : vector<2x32xf32>
    %326 = tpu.matmul %316, %4, %cst_100 {dimension_numbers = #tpu.dot_dimension_numbers<[1], [0], [0], [1], [0, 0, 1, 1], [], []>} : vector<2x32xf32>, vector<32x32xf32>, vector<2x32xf32> -> vector<2x32xf32>
    %327 = arith.addf %325, %326 : vector<2x32xf32>
    %328 = vector.extract_strided_slice %323 {offsets = [1, 0, 0], sizes = [1, 2, 32], strides = [1, 1, 1]} : vector<4x2x32xf32> to vector<1x2x32xf32>
    %329 = vector.shape_cast %328 : vector<1x2x32xf32> to vector<2x32xf32>
    %cst_101 = arith.constant dense<0.000000e+00> : vector<2x32xf32>
    %330 = tpu.matmul %316, %6, %cst_101 {dimension_numbers = #tpu.dot_dimension_numbers<[1], [0], [0], [1], [0, 0, 1, 1], [], []>} : vector<2x32xf32>, vector<32x32xf32>, vector<2x32xf32> -> vector<2x32xf32>
    %331 = arith.addf %329, %330 : vector<2x32xf32>
    %332 = vector.extract_strided_slice %323 {offsets = [2, 0, 0], sizes = [1, 2, 32], strides = [1, 1, 1]} : vector<4x2x32xf32> to vector<1x2x32xf32>
    %333 = vector.shape_cast %332 : vector<1x2x32xf32> to vector<2x32xf32>
    %cst_102 = arith.constant dense<0.000000e+00> : vector<2x32xf32>
    %334 = tpu.matmul %316, %8, %cst_102 {dimension_numbers = #tpu.dot_dimension_numbers<[1], [0], [0], [1], [0, 0, 1, 1], [], []>} : vector<2x32xf32>, vector<32x32xf32>, vector<2x32xf32> -> vector<2x32xf32>
    %335 = arith.addf %333, %334 : vector<2x32xf32>
    %336 = vector.extract_strided_slice %323 {offsets = [3, 0, 0], sizes = [1, 2, 32], strides = [1, 1, 1]} : vector<4x2x32xf32> to vector<1x2x32xf32>
    %337 = vector.shape_cast %336 : vector<1x2x32xf32> to vector<2x32xf32>
    %cst_103 = arith.constant dense<0.000000e+00> : vector<2x32xf32>
    %338 = tpu.matmul %316, %10, %cst_103 {dimension_numbers = #tpu.dot_dimension_numbers<[1], [0], [0], [1], [0, 0, 1, 1], [], []>} : vector<2x32xf32>, vector<32x32xf32>, vector<2x32xf32> -> vector<2x32xf32>
    %339 = arith.addf %337, %338 : vector<2x32xf32>
    %340 = arith.negf %327 : vector<2x32xf32>
    %341 = math.exp %340 : vector<2x32xf32>
    %cst_104 = arith.constant 1.000000e+00 : f32
    %342 = vector.broadcast %cst_104 : f32 to vector<2x32xf32>
    %343 = arith.addf %342, %341 : vector<2x32xf32>
    %344 = arith.divf %342, %343 : vector<2x32xf32>
    %345 = arith.negf %331 : vector<2x32xf32>
    %346 = math.exp %345 : vector<2x32xf32>
    %cst_105 = arith.constant 1.000000e+00 : f32
    %347 = vector.broadcast %cst_105 : f32 to vector<2x32xf32>
    %348 = arith.addf %347, %346 : vector<2x32xf32>
    %349 = arith.divf %347, %348 : vector<2x32xf32>
    %350 = math.tanh %335 : vector<2x32xf32>
    %351 = arith.negf %339 : vector<2x32xf32>
    %352 = math.exp %351 : vector<2x32xf32>
    %cst_106 = arith.constant 1.000000e+00 : f32
    %353 = vector.broadcast %cst_106 : f32 to vector<2x32xf32>
    %354 = arith.addf %353, %352 : vector<2x32xf32>
    %355 = arith.divf %353, %354 : vector<2x32xf32>
    %356 = arith.mulf %349, %314 : vector<2x32xf32>
    %357 = arith.mulf %344, %350 : vector<2x32xf32>
    %358 = arith.addf %356, %357 : vector<2x32xf32>
    %359 = math.tanh %358 : vector<2x32xf32>
    %360 = arith.mulf %355, %359 : vector<2x32xf32>
    %361 = arith.index_cast %c7_i32 : i32 to index
    %c0_107 = arith.constant 0 : index
    %c0_108 = arith.constant 0 : index
    %362 = vector.load %arg5[%361, %c0_107, %c0_108] : memref<8x2x32xf32, #tpu.memory_space<vmem>>, vector<1x2x32xf32>
    %363 = vector.shape_cast %362 : vector<1x2x32xf32> to vector<2x32xf32>
    %364 = vector.shape_cast %360 : vector<2x32xf32> to vector<1x2x32xf32>
    tpu.vector_store %arg5[%361, %c0_107, %c0_108], %364 {strides = array<i32>} : memref<8x2x32xf32, #tpu.memory_space<vmem>>, vector<1x2x32xf32>,
    %c8_i32 = arith.constant 8 : i32
    %c0_109 = arith.constant 0 : index
    %c0_110 = arith.constant 0 : index
    %365 = vector.load %arg8[%c0_109, %c0_110] : memref<2x32xf32, #tpu.memory_space<vmem>>, vector<2x32xf32>
    tpu.vector_store %arg8[%c0_109, %c0_110], %360 {strides = array<i32>} : memref<2x32xf32, #tpu.memory_space<vmem>>, vector<2x32xf32>,
    %c0_111 = arith.constant 0 : index
    %c0_112 = arith.constant 0 : index
    %366 = vector.load %arg9[%c0_111, %c0_112] : memref<2x32xf32, #tpu.memory_space<vmem>>, vector<2x32xf32>
    tpu.vector_store %arg9[%c0_111, %c0_112], %358 {strides = array<i32>} : memref<2x32xf32, #tpu.memory_space<vmem>>, vector<2x32xf32>,
    %c0_i32_113 = arith.constant 0 : i32
    %367 = arith.cmpi eq, %arg0, %c0_i32_113 : i32
    %368 = arith.extui %367 : i1 to i32
    %c0_i32_114 = arith.constant 0 : i32
    %369 = arith.cmpi ne, %368, %c0_i32_114 : i32
    scf.if %369 {
      %c0_115 = arith.constant 0 : index
      %c0_116 = arith.constant 0 : index
      %370 = vector.load %arg6[%c0_115, %c0_116] : memref<2x32xf32, #tpu.memory_space<vmem>>, vector<2x32xf32>
      tpu.vector_store %arg6[%c0_115, %c0_116], %360 {strides = array<i32>} : memref<2x32xf32, #tpu.memory_space<vmem>>, vector<2x32xf32>,
      %c0_117 = arith.constant 0 : index
      %c0_118 = arith.constant 0 : index
      %371 = vector.load %arg7[%c0_117, %c0_118] : memref<2x32xf32, #tpu.memory_space<vmem>>, vector<2x32xf32>
      tpu.vector_store %arg7[%c0_117, %c0_118], %358 {strides = array<i32>} : memref<2x32xf32, #tpu.memory_space<vmem>>, vector<2x32xf32>,
    } else {
    }
    return
  }
  func.func @transform_0(%arg0: i32) -> (i32, i32, i32, i32) {
    %c0_i32 = arith.constant 0 : i32
    %c0_i32_0 = arith.constant 0 : i32
    %c0_i32_1 = arith.constant 0 : i32
    %c0_i32_2 = arith.constant 0 : i32
    return %arg0, %c0_i32, %c0_i32_0, %c0_i32_1 : i32, i32, i32, i32
  }
  func.func @transform_1(%arg0: i32) -> (i32, i32, i32) {
    %c0_i32 = arith.constant 0 : i32
    %c0_i32_0 = arith.constant 0 : i32
    %c0_i32_1 = arith.constant 0 : i32
    %c0_i32_2 = arith.constant 0 : i32
    return %c0_i32, %c0_i32_0, %c0_i32_1 : i32, i32, i32
  }
  func.func @transform_2(%arg0: i32) -> (i32, i32) {
    %c0_i32 = arith.constant 0 : i32
    %c0_i32_0 = arith.constant 0 : i32
    %c0_i32_1 = arith.constant 0 : i32
    return %c0_i32, %c0_i32_0 : i32, i32
  }
  func.func @transform_3(%arg0: i32) -> (i32, i32) {
    %c0_i32 = arith.constant 0 : i32
    %c0_i32_0 = arith.constant 0 : i32
    %c0_i32_1 = arith.constant 0 : i32
    return %c0_i32, %c0_i32_0 : i32, i32
  }
  func.func @transform_4(%arg0: i32) -> (i32, i32, i32) {
    %c0_i32 = arith.constant 0 : i32
    %c0_i32_0 = arith.constant 0 : i32
    %c0_i32_1 = arith.constant 0 : i32
    return %arg0, %c0_i32, %c0_i32_0 : i32, i32, i32
  }
  func.func @transform_5(%arg0: i32) -> (i32, i32) {
    %c0_i32 = arith.constant 0 : i32
    %c0_i32_0 = arith.constant 0 : i32
    %c0_i32_1 = arith.constant 0 : i32
    return %c0_i32, %c0_i32_0 : i32, i32
  }
  func.func @transform_6(%arg0: i32) -> (i32, i32) {
    %c0_i32 = arith.constant 0 : i32
    %c0_i32_0 = arith.constant 0 : i32
    %c0_i32_1 = arith.constant 0 : i32
    return %c0_i32, %c0_i32_0 : i32, i32
  }
}

</mosaic_0001>

<bundles_post_ra>
// kernel: tpu_custom_call.1
= control target key start
LH: loop header
LB: loop body
LE: loop exit
PB: predicated region body
PF: predicated region fallthrough
CT: control target
= control target key end

     0   :  { %12 = vsyncpa [#allocation5], 0  ;;  %s4105_s0 = inlined_call_operand.hbm [shape: f32[8,4,2,32], index: 0, kind: input, shape index: {}]   ;;  %s4106_s1 = inlined_call_operand.hbm [shape: f32[4,32,32], index: 1, kind: input, shape index: {}]   ;;  %s4107_s2 = inlined_call_operand.vmem [shape: f32[2,32], index: 2, kind: input, shape index: {}]   ;;  %s4108_s3 = inlined_call_operand.vmem [shape: f32[2,32], index: 3, kind: input, shape index: {}]   ;;  %s4109_s4 = inlined_call_operand.hbm [shape: f32[8,2,32], index: 4, kind: output, shape index: {0}]   ;;  %s4110_s5 = inlined_call_operand.hbm [shape: f32[2,32], index: 5, kind: output, shape index: {1}]   ;;  %s4111_s6 = inlined_call_operand.hbm [shape: f32[2,32], index: 6, kind: output, shape index: {2}]  }
   0x1   :  { %13 = vsyncpa [#allocation8], 0 }
   0x2   :  { %14 = vsyncpa [#allocation6], 0 }
   0x3   :  { %15 = vsyncpa [#allocation11], 0  ;;  %s3694_s21 = smov [#allocation4]   ;;  %s3576_s25 = scalar_lea.hbm %s4105_s0, 1024 }
   0x4   :  { %s21_s22 = sshll.u32 %s3694_s21, 4  ;;  %p3577_p0 = scmp.ne.s32.totalorder %s4105_s0, %s3576_s25  ;;  %s22_s22 = int_to_ptr.vmem [resolvable:$true] %s21_s22 }
   0x5   :  { %p3580_p1 = scmp.lt.u32.totalorder %s3576_s25, %s4105_s0 }
   0x7   :  { %p3582_p2 = pnand %p3580_p1, %p3577_p0 }
   0x9   :  { %3585 = shalt.err (!%p3582_p2)
}
   0xa   :  { %s3586_s30 = scalar_lea.vmem %s22_s22, 1024  ;;  %p3591_p4 = scmp.lt.s32.totalorder %s22_s22, %s22_s22 }
   0xb   :  { %p3587_p3 = scmp.ne.s32.totalorder %s22_s22, %s3586_s30  ;;  %p3592_p5 = scmp.lt.s32.totalorder %s3586_s30, %s3586_s30 }
   0xd   :  { %p3593_p6 = por %p3592_p5, %p3591_p4 }
   0xf   :  { %p3594_p7 = pnand %p3593_p6, %p3587_p3 }
  0x11   :  { %3597 = shalt.err (!%p3594_p7)
}
  0x12   :  { %s3695_s7 = smov 32   ;;  %s3696_s8 = smov 2  }
  0x13   :  { %27 = dma.hbm_to_vmem [thread:$0]  %s4105_s0, 1024, %s22_s22, [#allocation5], %s3695_s7, %s3695_s7, %s3696_s8  }
  0x14   :  { %s3697_s11 = smov [#allocation7]   ;;  %s3598_s15 = scalar_lea.hbm %s4106_s1, 2048 }
  0x15   :  { %s33_s12 = sshll.u32 %s3697_s11, 4  ;;  %p3599_p8 = scmp.ne.s32.totalorder %s4106_s1, %s3598_s15  ;;  %s34_s12 = int_to_ptr.vmem [resolvable:$true] %s33_s12 }
  0x16   :  { %p3602_p9 = scmp.lt.u32.totalorder %s3598_s15, %s4106_s1 }
  0x18   :  { %p3604_p10 = pnand %p3602_p9, %p3599_p8 }
  0x1a   :  { %3607 = shalt.err (!%p3604_p10)
}
  0x1b   :  { %s3608_s20 = scalar_lea.vmem %s34_s12, 2048  ;;  %p3613_p12 = scmp.lt.s32.totalorder %s34_s12, %s34_s12 }
  0x1c   :  { %p3609_p11 = scmp.ne.s32.totalorder %s34_s12, %s3608_s20  ;;  %p3614_p13 = scmp.lt.s32.totalorder %s3608_s20, %s3608_s20 }
  0x1e   :  { %p3615_p0 = por %p3614_p13, %p3613_p12 }
  0x20   :  { %p3616_p1 = pnand %p3615_p0, %p3609_p11 }
  0x22   :  { %3619 = shalt.err (!%p3616_p1)
}
  0x23   :  { %s3698_s0 = smov 128   ;;  %s3699_s21 = smov 8  }
  0x24   :  { %39 = dma.hbm_to_vmem [thread:$0]  %s4106_s1, 2048, %s34_s12, [#allocation8], %s3698_s0, %s3698_s0, %s3699_s21  }
  0x25   :  { %3686 = dma.done.wait [#allocation5], 1024  }
  0x26   :  { %3687 = vsyncadd [#allocation5], 4294966272 }
  0x27   :  { %3688 = dma.done.wait [#allocation8], 2048  }
  0x28   :  { %3689 = vsyncadd [#allocation8], 4294965248  ;;  %v3700_v0 = vmov 0.0|0.0   ;;  %vm3701_vm0 = vmmov 0   ;;  %v3702_v1 = vmov 0.0   ;;  %v59_v2 = vld [vmem:[#allocation7] sm:$0xff] }
  0x29   :  { %3244 = vmatprep.subr.bf16.mxu0 %v3700_v0  ;;  %3250 = vmatprep.subr.bf16.mxu1 %v3700_v0  ;;  %v60_v3 = vld [vmem:[#allocation7 + $0x8] sm:$0xff]  ;;  %v64_v4 = vld [vmem:[#allocation7 + $0x20] sm:$0xff]  ;;  %vm55_vm1 = vcmask 254976   ;;  %v61_v7 = vld [vmem:[#allocation7 + $0x10] sm:$0xff]  ;;  %vm84_vm2 = vcmask 261120   ;;  %s3704_s27 = smov [#allocation9]  }
  0x2a   :  { %2900 = vmatprep.mubr.msk.f32.mxu0 %vm3701_vm0, %v3702_v1  ;;  %2911 = vmatprep.mubr.msk.f32.mxu1 %vm3701_vm0, %v3702_v1  ;;  %v3774_v5 = vpack.c.bf16 %v60_v3, %v59_v2  ;;  %v65_v6 = vld [vmem:[#allocation7 + $0x28] sm:$0xff]  ;;  %v62_v8 = vld [vmem:[#allocation7 + $0x18] sm:$0xff]  ;;  %v66_v10 = vld [vmem:[#allocation7 + $0x30] sm:$0xff]  ;;  %s2636_s28 = sshll.u32 %s3704_s27, 4  ;;  %s3705_s29 = smov [#allocation12]   ;;  %s4049_s28 = int_to_ptr.vmem [resolvable:$true] %s2636_s28 }
  0x2b   :  { %v3776_v9 = vpack.c.bf16 %v65_v6, %v64_v4  ;;  %v67_v11 = vld [vmem:[#allocation7 + $0x38] sm:$0xff]  ;;  %v3782_v13 = vpack.c.bf16 %v62_v8, %v61_v7  ;;  %v69_v15 = vld [vmem:[#allocation7 + $0x40] sm:$0xff]  ;;  %v70_v16 = vld [vmem:[#allocation7 + $0x48] sm:$0xff]  ;;  %s2659_s30 = sshll.u32 %s3705_s29, 4  ;;  %s4054_s30 = int_to_ptr.vmem [resolvable:$true] %s2659_s30 }
  0x2c   :  { %v54_v12 = vld [vmem:[%s4107_s2] sm:$0x3]  ;;  %3246 = vmatpush3.bf16.msra.mxu0 %v3774_v5  ;;  %v3787_v14 = vpack.c.bf16 %v67_v11, %v66_v10  ;;  %v74_v17 = vld [vmem:[#allocation7 + $0x60] sm:$0xff]  ;;  %v75_v18 = vld [vmem:[#allocation7 + $0x68] sm:$0xff]  ;;  %v3793_v19 = vpack.c.bf16 %v70_v16, %v69_v15 }
  0x2d   :  { %56 = vst.msk [vmem:[#allocation2] sm:$0x3] %vm55_vm1, %v54_v12  ;;  %3252 = vmatpush3.bf16.msra.mxu1 %v3776_v9  ;;  %3247 = vmatprep.subr.bf16.mxu0 %v3700_v0  ;;  %v3795_v20 = vpack.c.bf16 %v75_v18, %v74_v17  ;;  %v71_v21 = vld [vmem:[#allocation7 + $0x50] sm:$0xff]  ;;  %v72_v22 = vld [vmem:[#allocation7 + $0x58] sm:$0xff]  ;;  %v80_v29 = vld [vmem:[#allocation4] sm:$0x3] }
  0x2e   :  { %3253 = vmatprep.subr.bf16.mxu1 %v3700_v0  ;;  %v76_v23 = vld [vmem:[#allocation7 + $0x70] sm:$0xff]  ;;  %v77_v24 = vld [vmem:[#allocation7 + $0x78] sm:$0xff]  ;;  %v3802_v26 = vpack.c.bf16 %v72_v22, %v71_v21  ;;  %v81_v30 = vld [vmem:[#allocation4 + $0x2] sm:$0x3] }
  0x2f   :  { %v3804_v27 = vpack.c.bf16 %v77_v24, %v76_v23  ;;  %v57_v28 = vld [vmem:[%s4108_s3] sm:$0x3]  ;;  %v83_v39 = vld [vmem:[#allocation4 + $0x6] sm:$0x3]  ;;  %v82_v42 = vld [vmem:[#allocation4 + $0x4] sm:$0x3] }
  0x30   :  { %3249 = vmatpush3.bf16.msra.mxu0 %v3782_v13  ;;  %58 = vst.msk [vmem:[#allocation3] sm:$0x3] %vm55_vm1, %v57_v28  ;;  %v399_v2 = vld [vmem:[#allocation4 + $0x8] sm:$0x3]  ;;  %v400_v3 = vld [vmem:[#allocation4 + $0xa] sm:$0x3] }
  0x31   :  { %3255 = vmatpush3.bf16.msra.mxu1 %v3787_v14  ;;  %3256 = vmatprep.subr.bf16.mxu0 %v3700_v0  ;;  %v402_v16 = vld [vmem:[#allocation4 + $0xe] sm:$0x3]  ;;  %v401_v24 = vld [vmem:[#allocation4 + $0xc] sm:$0x3]  ;;  %s3703_s3 = smov [#allocation10]  }
  0x32   :  { %3262 = vmatprep.subr.bf16.mxu1 %v3700_v0  ;;  %s2649_s26 = sshll.u32 %s3703_s3, 4  ;;  %s2650_s26 = int_to_ptr.vmem [resolvable:$true] %s2649_s26 }
  0x33   :  { %s3620_s9 = scalar_lea.vmem %s2650_s26, 32  ;;  %p3625_p3 = scmp.lt.s32.totalorder %s2650_s26, %s2650_s26 }
  0x34   :  { %v78_v25 = vld [vmem:[#allocation2] sm:$0x3]  ;;  %p3621_p2 = scmp.ne.s32.totalorder %s2650_s26, %s3620_s9  ;;  %p3626_p4 = scmp.lt.s32.totalorder %s3620_s9, %s3620_s9 }
  0x35   :  { %2901 = vmatmul.mubr.msk.f32.vlgmr.msra.gmra.mrb[0].mxu0 %vm84_vm2, %v78_v25  ;;  %2912 = vmatmul.mubr.msk.f32.vlgmr.msra.gmra.mrb[0].mxu1 %vm84_vm2, %v78_v25 }
  0x36   :  { %3258 = vmatpush3.bf16.msra.mxu0 %v3793_v19  ;;  %3264 = vmatpush3.bf16.msra.mxu1 %v3795_v20  ;;  %p3627_p5 = por %p3626_p4, %p3625_p3 }
  0x37   :  { %3259 = vmatprep.subr.bf16.mxu0 %v3700_v0  ;;  %3265 = vmatprep.subr.bf16.mxu1 %v3700_v0  ;;  %v79_v54 = vld [vmem:[#allocation3] sm:$0x3] }
  0x38   :  { %2922 = vmatprep.mubr.msk.f32.mxu0 %vm3701_vm0, %v3702_v1  ;;  %2933 = vmatprep.mubr.msk.f32.mxu1 %vm3701_vm0, %v3702_v1  ;;  %p3628_p6 = pnand %p3627_p5, %p3621_p2 }
  0x3a   :  { %3261 = vmatpush3.bf16.msra.mxu0 %v3802_v26  ;;  %3267 = vmatpush3.bf16.msra.mxu1 %v3804_v27 }
  0x3b   :  { %3268 = vmatprep.subr.bf16.mxu0 %v3700_v0  ;;  %3274 = vmatprep.subr.bf16.mxu1 %v3700_v0 }
  0x3d   :  { %2923 = vmatmul.mubr.msk.f32.vlgmr.msra.gmra.mrb[2].mxu0 %vm84_vm2, %v78_v25  ;;  %2934 = vmatmul.mubr.msk.f32.vlgmr.msra.gmra.mrb[2].mxu1 %vm84_vm2, %v78_v25 }
  0x3e   :  { %3270 = vmatpush3.bf16.msra.mxu0 %v3774_v5  ;;  %3276 = vmatpush3.bf16.msra.mxu1 %v3776_v9 }
  0x3f   :  { %3271 = vmatprep.subr.bf16.mxu0 %v3700_v0  ;;  %3277 = vmatprep.subr.bf16.mxu1 %v3700_v0 }
  0x40   :  { %2944 = vmatprep.mubr.msk.f32.mxu0 %vm3701_vm0, %v3702_v1  ;;  %2955 = vmatprep.mubr.msk.f32.mxu1 %vm3701_vm0, %v3702_v1 }
  0x42   :  { %3273 = vmatpush3.bf16.msra.mxu0 %v3782_v13  ;;  %3279 = vmatpush3.bf16.msra.mxu1 %v3787_v14 }
  0x43   :  { %3280 = vmatprep.subr.bf16.mxu0 %v3700_v0  ;;  %3286 = vmatprep.subr.bf16.mxu1 %v3700_v0 }
 0x108   :  { %v154_v31 = vpop.f32.mrb[0].mxu0  ;;  %v225_v32 = vpop.f32.mrb[0].mxu1 }
 0x109   :  { %v158_v33 = vadd.f32 %v154_v31, %v80_v29  ;;  %v229_v34 = vadd.f32 %v225_v32, %v81_v30  ;;  %v2902_v35 = vpop.f32.mrb[1].mxu0  ;;  %v2913_v36 = vpop.f32.mrb[1].mxu1 }
 0x10b   :  { %v2680_v37 = vmul.f32 -1.442695, %v158_v33  ;;  %v2681_v38 = vmul.f32 -1.442695, %v229_v34 }
 0x10d   :  { %3448 = vpow2.f32 %v2680_v37 }
 0x10e   :  { %3450 = vpow2.f32 %v2681_v38 }
 0x110   :  { %v296_v40 = vpop.f32.mrb[2].mxu0  ;;  %v367_v41 = vpop.f32.mrb[2].mxu1 }
 0x111   :  { %v371_v43 = vadd.f32 %v367_v41, %v83_v39  ;;  %v2924_v44 = vpop.f32.mrb[3].mxu0  ;;  %v2935_v45 = vpop.f32.mrb[3].mxu1  ;;  %v300_v47 = vadd.f32 %v296_v40, %v82_v42 }
 0x112   :  { %v717_v44 = vld [vmem:[#allocation4 + $0x10] sm:$0x3]  ;;  %v718_v45 = vld [vmem:[#allocation4 + $0x12] sm:$0x3] }
 0x113   :  { %v2682_v46 = vmul.f32 -1.442695, %v371_v43 }
 0x115   :  { %3452 = vpow2.f32 %v2682_v46 }
 0x116   :  { %3454 = vtanh.f32 %v300_v47 }
 0x117   :  { %v3449_v48 = vpop.eup %3448 }
 0x118   :  { %v3451_v49 = vpop.eup %3450  ;;  %v375_v50 = vadd.f32 1.0, %v3449_v48 }
 0x119   :  { %v381_v51 = vadd.f32 1.0, %v3451_v49 }
 0x11a   :  { %3456 = vrcp.f32 %v375_v50 }
 0x11b   :  { %3458 = vrcp.f32 %v381_v51 }
 0x11f   :  { %v3453_v52 = vpop.eup %3452 }
 0x120   :  { %v3455_v53 = vpop.eup %3454  ;;  %v388_v56 = vadd.f32 1.0, %v3453_v52 }
 0x122   :  { %3460 = vrcp.f32 %v388_v56 }
 0x124   :  { %v3457_v55 = vpop.eup %3456 }
 0x125   :  { %v3459_v57 = vpop.eup %3458  ;;  %v392_v58 = vmul.f32 %v3457_v55, %v3455_v53 }
 0x126   :  { %v391_v59 = vmul.f32 %v3459_v57, %v79_v54  ;;  %v720_v54 = vld [vmem:[#allocation4 + $0x16] sm:$0x3] }
 0x128   :  { %v3834_v60 = vadd.f32 %v392_v58, %v391_v59 }
 0x12a   :  { %3462 = vtanh.f32 %v3834_v60 }
 0x12c   :  { %v3461_v61 = vpop.eup %3460 }
 0x134   :  { %v3463_v62 = vpop.eup %3462 }
 0x135   :  { %v395_v63 = vmul.f32 %v3463_v62, %v3461_v61 }
 0x137   :  { %2945 = vmatmul.mubr.msk.f32.vlgmr.msra.gmra.mrb[4].mxu0 %vm84_vm2, %v395_v63  ;;  %397 = vst.msk [vmem:[#allocation9] sm:$0x3] %vm55_vm1, %v395_v63  ;;  %2956 = vmatmul.mubr.msk.f32.vlgmr.msra.gmra.mrb[4].mxu1 %vm84_vm2, %v395_v63 }
 0x138   :  { %3282 = vmatpush3.bf16.msra.mxu0 %v3793_v19  ;;  %3288 = vmatpush3.bf16.msra.mxu1 %v3795_v20 }
 0x139   :  { %3283 = vmatprep.subr.bf16.mxu0 %v3700_v0  ;;  %3289 = vmatprep.subr.bf16.mxu1 %v3700_v0 }
 0x13a   :  { %2966 = vmatprep.mubr.msk.f32.mxu0 %vm3701_vm0, %v3702_v1  ;;  %2977 = vmatprep.mubr.msk.f32.mxu1 %vm3701_vm0, %v3702_v1 }
 0x13c   :  { %3285 = vmatpush3.bf16.msra.mxu0 %v3802_v26  ;;  %3291 = vmatpush3.bf16.msra.mxu1 %v3804_v27 }
 0x13d   :  { %3292 = vmatprep.subr.bf16.mxu0 %v3700_v0  ;;  %3298 = vmatprep.subr.bf16.mxu1 %v3700_v0 }
 0x13f   :  { %2967 = vmatmul.mubr.msk.f32.vlgmr.msra.gmra.mrb[6].mxu0 %vm84_vm2, %v395_v63  ;;  %2978 = vmatmul.mubr.msk.f32.vlgmr.msra.gmra.mrb[6].mxu1 %vm84_vm2, %v395_v63 }
 0x140   :  { %3294 = vmatpush3.bf16.msra.mxu0 %v3774_v5  ;;  %3300 = vmatpush3.bf16.msra.mxu1 %v3776_v9 }
 0x141   :  { %3295 = vmatprep.subr.bf16.mxu0 %v3700_v0  ;;  %3301 = vmatprep.subr.bf16.mxu1 %v3700_v0 }
 0x142   :  { %2988 = vmatprep.mubr.msk.f32.mxu0 %vm3701_vm0, %v3702_v1  ;;  %2999 = vmatprep.mubr.msk.f32.mxu1 %vm3701_vm0, %v3702_v1 }
 0x144   :  { %3297 = vmatpush3.bf16.msra.mxu0 %v3782_v13  ;;  %3303 = vmatpush3.bf16.msra.mxu1 %v3787_v14 }
 0x145   :  { %3304 = vmatprep.subr.bf16.mxu0 %v3700_v0  ;;  %3310 = vmatprep.subr.bf16.mxu1 %v3700_v0 }
 0x20a   :  { %v472_v4 = vpop.f32.mrb[4].mxu0  ;;  %v543_v6 = vpop.f32.mrb[4].mxu1 }
 0x20b   :  { %v476_v7 = vadd.f32 %v472_v4, %v399_v2  ;;  %v547_v8 = vadd.f32 %v543_v6, %v400_v3  ;;  %v2946_v10 = vpop.f32.mrb[5].mxu0  ;;  %v2957_v11 = vpop.f32.mrb[5].mxu1 }
 0x20d   :  { %v2687_v12 = vmul.f32 -1.442695, %v476_v7  ;;  %v2688_v15 = vmul.f32 -1.442695, %v547_v8 }
 0x20f   :  { %3464 = vpow2.f32 %v2687_v12 }
 0x210   :  { %3466 = vpow2.f32 %v2688_v15 }
 0x212   :  { %v614_v17 = vpop.f32.mrb[6].mxu0  ;;  %v685_v18 = vpop.f32.mrb[6].mxu1 }
 0x213   :  { %v689_v21 = vadd.f32 %v685_v18, %v402_v16  ;;  %v2968_v22 = vpop.f32.mrb[7].mxu0  ;;  %v2979_v23 = vpop.f32.mrb[7].mxu1  ;;  %v618_v28 = vadd.f32 %v614_v17, %v401_v24 }
 0x214   :  { %v1035_v22 = vld [vmem:[#allocation4 + $0x18] sm:$0x3]  ;;  %v1036_v23 = vld [vmem:[#allocation4 + $0x1a] sm:$0x3] }
 0x215   :  { %v2689_v25 = vmul.f32 -1.442695, %v689_v21 }
 0x217   :  { %3468 = vpow2.f32 %v2689_v25 }
 0x218   :  { %3470 = vtanh.f32 %v618_v28 }
 0x219   :  { %v3465_v29 = vpop.eup %3464 }
 0x21a   :  { %v3467_v30 = vpop.eup %3466  ;;  %v693_v31 = vadd.f32 1.0, %v3465_v29 }
 0x21b   :  { %v699_v32 = vadd.f32 1.0, %v3467_v30 }
 0x21c   :  { %3472 = vrcp.f32 %v693_v31 }
 0x21d   :  { %3474 = vrcp.f32 %v699_v32 }
 0x221   :  { %v3469_v33 = vpop.eup %3468 }
 0x222   :  { %v3471_v34 = vpop.eup %3470  ;;  %v706_v38 = vadd.f32 1.0, %v3469_v33 }
 0x224   :  { %3476 = vrcp.f32 %v706_v38 }
 0x226   :  { %v3473_v35 = vpop.eup %3472 }
 0x227   :  { %v3475_v36 = vpop.eup %3474  ;;  %v710_v37 = vmul.f32 %v3473_v35, %v3471_v34  ;;  %v1038_v34 = vld [vmem:[#allocation4 + $0x1e] sm:$0x3] }
 0x228   :  { %v709_v39 = vmul.f32 %v3475_v36, %v3834_v60  ;;  %v719_v60 = vld [vmem:[#allocation4 + $0x14] sm:$0x3] }
 0x22a   :  { %v3867_v40 = vadd.f32 %v710_v37, %v709_v39 }
 0x22c   :  { %3478 = vtanh.f32 %v3867_v40 }
 0x22e   :  { %v3477_v41 = vpop.eup %3476 }
 0x236   :  { %v3479_v42 = vpop.eup %3478 }
 0x237   :  { %v713_v43 = vmul.f32 %v3479_v42, %v3477_v41 }
 0x239   :  { %2989 = vmatmul.mubr.msk.f32.vlgmr.msra.gmra.mrb[8].mxu0 %vm84_vm2, %v713_v43  ;;  %715 = vst.msk [vmem:[#allocation9 + $0x2] sm:$0x3] %vm55_vm1, %v713_v43  ;;  %3000 = vmatmul.mubr.msk.f32.vlgmr.msra.gmra.mrb[8].mxu1 %vm84_vm2, %v713_v43 }
 0x23a   :  { %3306 = vmatpush3.bf16.msra.mxu0 %v3793_v19  ;;  %3312 = vmatpush3.bf16.msra.mxu1 %v3795_v20 }
 0x23b   :  { %3307 = vmatprep.subr.bf16.mxu0 %v3700_v0  ;;  %3313 = vmatprep.subr.bf16.mxu1 %v3700_v0 }
 0x23c   :  { %3010 = vmatprep.mubr.msk.f32.mxu0 %vm3701_vm0, %v3702_v1  ;;  %3021 = vmatprep.mubr.msk.f32.mxu1 %vm3701_vm0, %v3702_v1 }
 0x23e   :  { %3309 = vmatpush3.bf16.msra.mxu0 %v3802_v26  ;;  %3315 = vmatpush3.bf16.msra.mxu1 %v3804_v27 }
 0x23f   :  { %3316 = vmatprep.subr.bf16.mxu0 %v3700_v0  ;;  %3322 = vmatprep.subr.bf16.mxu1 %v3700_v0 }
 0x241   :  { %3011 = vmatmul.mubr.msk.f32.vlgmr.msra.gmra.mrb[10].mxu0 %vm84_vm2, %v713_v43  ;;  %3022 = vmatmul.mubr.msk.f32.vlgmr.msra.gmra.mrb[10].mxu1 %vm84_vm2, %v713_v43 }
 0x242   :  { %3318 = vmatpush3.bf16.msra.mxu0 %v3774_v5  ;;  %3324 = vmatpush3.bf16.msra.mxu1 %v3776_v9 }
 0x243   :  { %3319 = vmatprep.subr.bf16.mxu0 %v3700_v0  ;;  %3325 = vmatprep.subr.bf16.mxu1 %v3700_v0 }
 0x244   :  { %3032 = vmatprep.mubr.msk.f32.mxu0 %vm3701_vm0, %v3702_v1  ;;  %3043 = vmatprep.mubr.msk.f32.mxu1 %vm3701_vm0, %v3702_v1 }
 0x246   :  { %3321 = vmatpush3.bf16.msra.mxu0 %v3782_v13  ;;  %3327 = vmatpush3.bf16.msra.mxu1 %v3787_v14 }
 0x247   :  { %3328 = vmatprep.subr.bf16.mxu0 %v3700_v0  ;;  %3334 = vmatprep.subr.bf16.mxu1 %v3700_v0 }
 0x30c   :  { %v790_v46 = vpop.f32.mrb[8].mxu0  ;;  %v861_v47 = vpop.f32.mrb[8].mxu1 }
 0x30d   :  { %v794_v48 = vadd.f32 %v790_v46, %v717_v44  ;;  %v865_v49 = vadd.f32 %v861_v47, %v718_v45  ;;  %v2990_v50 = vpop.f32.mrb[9].mxu0  ;;  %v3001_v51 = vpop.f32.mrb[9].mxu1 }
 0x30f   :  { %v2694_v52 = vmul.f32 -1.442695, %v794_v48  ;;  %v2695_v53 = vmul.f32 -1.442695, %v865_v49 }
 0x311   :  { %3480 = vpow2.f32 %v2694_v52 }
 0x312   :  { %3482 = vpow2.f32 %v2695_v53 }
 0x314   :  { %v932_v55 = vpop.f32.mrb[10].mxu0  ;;  %v1003_v56 = vpop.f32.mrb[10].mxu1 }
 0x315   :  { %v1007_v57 = vadd.f32 %v1003_v56, %v720_v54  ;;  %v3012_v58 = vpop.f32.mrb[11].mxu0  ;;  %v3023_v59 = vpop.f32.mrb[11].mxu1  ;;  %v936_v62 = vadd.f32 %v932_v55, %v719_v60 }
 0x316   :  { %v1353_v58 = vld [vmem:[#allocation4 + $0x20] sm:$0x3]  ;;  %v1354_v59 = vld [vmem:[#allocation4 + $0x22] sm:$0x3] }
 0x317   :  { %v2696_v61 = vmul.f32 -1.442695, %v1007_v57 }
 0x319   :  { %3484 = vpow2.f32 %v2696_v61 }
 0x31a   :  { %3486 = vtanh.f32 %v936_v62 }
 0x31b   :  { %v3481_v63 = vpop.eup %3480 }
 0x31c   :  { %v3483_v2 = vpop.eup %3482  ;;  %v1011_v3 = vadd.f32 1.0, %v3481_v63 }
 0x31d   :  { %v1017_v4 = vadd.f32 1.0, %v3483_v2 }
 0x31e   :  { %3488 = vrcp.f32 %v1011_v3 }
 0x31f   :  { %3490 = vrcp.f32 %v1017_v4 }
 0x323   :  { %v3485_v6 = vpop.eup %3484 }
 0x324   :  { %v3487_v7 = vpop.eup %3486  ;;  %v1024_v12 = vadd.f32 1.0, %v3485_v6 }
 0x326   :  { %3492 = vrcp.f32 %v1024_v12 }
 0x328   :  { %v3489_v8 = vpop.eup %3488 }
 0x329   :  { %v3491_v10 = vpop.eup %3490  ;;  %v1028_v11 = vmul.f32 %v3489_v8, %v3487_v7  ;;  %v1356_v7 = vld [vmem:[#allocation4 + $0x26] sm:$0x3] }
 0x32a   :  { %v1027_v15 = vmul.f32 %v3491_v10, %v3867_v40  ;;  %v1037_v40 = vld [vmem:[#allocation4 + $0x1c] sm:$0x3] }
 0x32c   :  { %v3900_v16 = vadd.f32 %v1028_v11, %v1027_v15 }
 0x32e   :  { %3494 = vtanh.f32 %v3900_v16 }
 0x330   :  { %v3493_v17 = vpop.eup %3492 }
 0x338   :  { %v3495_v18 = vpop.eup %3494 }
 0x339   :  { %v1031_v21 = vmul.f32 %v3495_v18, %v3493_v17 }
 0x33b   :  { %3033 = vmatmul.mubr.msk.f32.vlgmr.msra.gmra.mrb[12].mxu0 %vm84_vm2, %v1031_v21  ;;  %1033 = vst.msk [vmem:[#allocation9 + $0x4] sm:$0x3] %vm55_vm1, %v1031_v21  ;;  %3044 = vmatmul.mubr.msk.f32.vlgmr.msra.gmra.mrb[12].mxu1 %vm84_vm2, %v1031_v21 }
 0x33c   :  { %3330 = vmatpush3.bf16.msra.mxu0 %v3793_v19  ;;  %3336 = vmatpush3.bf16.msra.mxu1 %v3795_v20 }
 0x33d   :  { %3331 = vmatprep.subr.bf16.mxu0 %v3700_v0  ;;  %3337 = vmatprep.subr.bf16.mxu1 %v3700_v0 }
 0x33e   :  { %3054 = vmatprep.mubr.msk.f32.mxu0 %vm3701_vm0, %v3702_v1  ;;  %3065 = vmatprep.mubr.msk.f32.mxu1 %vm3701_vm0, %v3702_v1 }
 0x340   :  { %3333 = vmatpush3.bf16.msra.mxu0 %v3802_v26  ;;  %3339 = vmatpush3.bf16.msra.mxu1 %v3804_v27 }
 0x341   :  { %3340 = vmatprep.subr.bf16.mxu0 %v3700_v0  ;;  %3346 = vmatprep.subr.bf16.mxu1 %v3700_v0 }
 0x343   :  { %3055 = vmatmul.mubr.msk.f32.vlgmr.msra.gmra.mrb[14].mxu0 %vm84_vm2, %v1031_v21  ;;  %3066 = vmatmul.mubr.msk.f32.vlgmr.msra.gmra.mrb[14].mxu1 %vm84_vm2, %v1031_v21 }
 0x344   :  { %3342 = vmatpush3.bf16.msra.mxu0 %v3774_v5  ;;  %3348 = vmatpush3.bf16.msra.mxu1 %v3776_v9 }
 0x345   :  { %3343 = vmatprep.subr.bf16.mxu0 %v3700_v0  ;;  %3349 = vmatprep.subr.bf16.mxu1 %v3700_v0 }
 0x346   :  { %3076 = vmatprep.mubr.msk.f32.mxu0 %vm3701_vm0, %v3702_v1  ;;  %3087 = vmatprep.mubr.msk.f32.mxu1 %vm3701_vm0, %v3702_v1 }
 0x348   :  { %3345 = vmatpush3.bf16.msra.mxu0 %v3782_v13  ;;  %3351 = vmatpush3.bf16.msra.mxu1 %v3787_v14 }
 0x349   :  { %3352 = vmatprep.subr.bf16.mxu0 %v3700_v0  ;;  %3358 = vmatprep.subr.bf16.mxu1 %v3700_v0 }
 0x40e   :  { %v1108_v24 = vpop.f32.mrb[12].mxu0  ;;  %v1179_v25 = vpop.f32.mrb[12].mxu1 }
 0x40f   :  { %v1112_v28 = vadd.f32 %v1108_v24, %v1035_v22  ;;  %v1183_v29 = vadd.f32 %v1179_v25, %v1036_v23  ;;  %v3034_v30 = vpop.f32.mrb[13].mxu0  ;;  %v3045_v31 = vpop.f32.mrb[13].mxu1 }
 0x411   :  { %v2701_v32 = vmul.f32 -1.442695, %v1112_v28  ;;  %v2702_v33 = vmul.f32 -1.442695, %v1183_v29 }
 0x413   :  { %3496 = vpow2.f32 %v2701_v32 }
 0x414   :  { %3498 = vpow2.f32 %v2702_v33 }
 0x416   :  { %v1250_v35 = vpop.f32.mrb[14].mxu0  ;;  %v1321_v36 = vpop.f32.mrb[14].mxu1 }
 0x417   :  { %v1325_v37 = vadd.f32 %v1321_v36, %v1038_v34  ;;  %v3056_v38 = vpop.f32.mrb[15].mxu0  ;;  %v3067_v39 = vpop.f32.mrb[15].mxu1  ;;  %v1254_v42 = vadd.f32 %v1250_v35, %v1037_v40 }
 0x418   :  { %v1671_v38 = vld [vmem:[#allocation4 + $0x28] sm:$0x3]  ;;  %v1672_v39 = vld [vmem:[#allocation4 + $0x2a] sm:$0x3] }
 0x419   :  { %v2703_v41 = vmul.f32 -1.442695, %v1325_v37 }
 0x41b   :  { %3500 = vpow2.f32 %v2703_v41 }
 0x41c   :  { %3502 = vtanh.f32 %v1254_v42 }
 0x41d   :  { %v3497_v43 = vpop.eup %3496 }
 0x41e   :  { %v3499_v44 = vpop.eup %3498  ;;  %v1329_v45 = vadd.f32 1.0, %v3497_v43 }
 0x41f   :  { %v1335_v46 = vadd.f32 1.0, %v3499_v44 }
 0x420   :  { %3504 = vrcp.f32 %v1329_v45 }
 0x421   :  { %3506 = vrcp.f32 %v1335_v46 }
 0x425   :  { %v3501_v47 = vpop.eup %3500 }
 0x426   :  { %v3503_v48 = vpop.eup %3502  ;;  %v1342_v52 = vadd.f32 1.0, %v3501_v47 }
 0x428   :  { %3508 = vrcp.f32 %v1342_v52 }
 0x42a   :  { %v3505_v49 = vpop.eup %3504 }
 0x42b   :  { %v3507_v50 = vpop.eup %3506  ;;  %v1346_v51 = vmul.f32 %v3505_v49, %v3503_v48  ;;  %v1674_v48 = vld [vmem:[#allocation4 + $0x2e] sm:$0x3] }
 0x42c   :  { %v1345_v53 = vmul.f32 %v3507_v50, %v3900_v16  ;;  %v1355_v16 = vld [vmem:[#allocation4 + $0x24] sm:$0x3] }
 0x42e   :  { %v3933_v54 = vadd.f32 %v1346_v51, %v1345_v53 }
 0x430   :  { %3510 = vtanh.f32 %v3933_v54 }
 0x432   :  { %v3509_v55 = vpop.eup %3508 }
 0x43a   :  { %v3511_v56 = vpop.eup %3510 }
 0x43b   :  { %v1349_v57 = vmul.f32 %v3511_v56, %v3509_v55 }
 0x43d   :  { %3077 = vmatmul.mubr.msk.f32.vlgmr.msra.gmra.mrb[16].mxu0 %vm84_vm2, %v1349_v57  ;;  %1351 = vst.msk [vmem:[#allocation9 + $0x6] sm:$0x3] %vm55_vm1, %v1349_v57  ;;  %3088 = vmatmul.mubr.msk.f32.vlgmr.msra.gmra.mrb[16].mxu1 %vm84_vm2, %v1349_v57 }
 0x43e   :  { %3354 = vmatpush3.bf16.msra.mxu0 %v3793_v19  ;;  %3360 = vmatpush3.bf16.msra.mxu1 %v3795_v20 }
 0x43f   :  { %3355 = vmatprep.subr.bf16.mxu0 %v3700_v0  ;;  %3361 = vmatprep.subr.bf16.mxu1 %v3700_v0 }
 0x440   :  { %3098 = vmatprep.mubr.msk.f32.mxu0 %vm3701_vm0, %v3702_v1  ;;  %3109 = vmatprep.mubr.msk.f32.mxu1 %vm3701_vm0, %v3702_v1 }
 0x442   :  { %3357 = vmatpush3.bf16.msra.mxu0 %v3802_v26  ;;  %3363 = vmatpush3.bf16.msra.mxu1 %v3804_v27 }
 0x443   :  { %3364 = vmatprep.subr.bf16.mxu0 %v3700_v0  ;;  %3370 = vmatprep.subr.bf16.mxu1 %v3700_v0 }
 0x445   :  { %3099 = vmatmul.mubr.msk.f32.vlgmr.msra.gmra.mrb[18].mxu0 %vm84_vm2, %v1349_v57  ;;  %3110 = vmatmul.mubr.msk.f32.vlgmr.msra.gmra.mrb[18].mxu1 %vm84_vm2, %v1349_v57 }
 0x446   :  { %3366 = vmatpush3.bf16.msra.mxu0 %v3774_v5  ;;  %3372 = vmatpush3.bf16.msra.mxu1 %v3776_v9 }
 0x447   :  { %3367 = vmatprep.subr.bf16.mxu0 %v3700_v0  ;;  %3373 = vmatprep.subr.bf16.mxu1 %v3700_v0 }
 0x448   :  { %3120 = vmatprep.mubr.msk.f32.mxu0 %vm3701_vm0, %v3702_v1  ;;  %3131 = vmatprep.mubr.msk.f32.mxu1 %vm3701_vm0, %v3702_v1 }
 0x44a   :  { %3369 = vmatpush3.bf16.msra.mxu0 %v3782_v13  ;;  %3375 = vmatpush3.bf16.msra.mxu1 %v3787_v14 }
 0x44b   :  { %3376 = vmatprep.subr.bf16.mxu0 %v3700_v0  ;;  %3382 = vmatprep.subr.bf16.mxu1 %v3700_v0 }
 0x510   :  { %v1426_v60 = vpop.f32.mrb[16].mxu0  ;;  %v1497_v61 = vpop.f32.mrb[16].mxu1 }
 0x511   :  { %v1430_v62 = vadd.f32 %v1426_v60, %v1353_v58  ;;  %v1501_v63 = vadd.f32 %v1497_v61, %v1354_v59  ;;  %v3078_v2 = vpop.f32.mrb[17].mxu0  ;;  %v3089_v3 = vpop.f32.mrb[17].mxu1 }
 0x513   :  { %v2708_v4 = vmul.f32 -1.442695, %v1430_v62  ;;  %v2709_v6 = vmul.f32 -1.442695, %v1501_v63 }
 0x515   :  { %3512 = vpow2.f32 %v2708_v4 }
 0x516   :  { %3514 = vpow2.f32 %v2709_v6 }
 0x518   :  { %v1568_v8 = vpop.f32.mrb[18].mxu0  ;;  %v1639_v10 = vpop.f32.mrb[18].mxu1 }
 0x519   :  { %v1643_v11 = vadd.f32 %v1639_v10, %v1356_v7  ;;  %v3100_v12 = vpop.f32.mrb[19].mxu0  ;;  %v3111_v15 = vpop.f32.mrb[19].mxu1  ;;  %v1572_v18 = vadd.f32 %v1568_v8, %v1355_v16 }
 0x51b   :  { %v2710_v17 = vmul.f32 -1.442695, %v1643_v11 }
 0x51d   :  { %3516 = vpow2.f32 %v2710_v17 }
 0x51e   :  { %3518 = vtanh.f32 %v1572_v18 }
 0x51f   :  { %v3513_v21 = vpop.eup %3512 }
 0x520   :  { %v3515_v22 = vpop.eup %3514  ;;  %v1647_v23 = vadd.f32 1.0, %v3513_v21 }
 0x521   :  { %v1653_v24 = vadd.f32 1.0, %v3515_v22 }
 0x522   :  { %3520 = vrcp.f32 %v1647_v23 }
 0x523   :  { %3522 = vrcp.f32 %v1653_v24  ;;  %v1992_v24 = vld [vmem:[#allocation4 + $0x36] sm:$0x3] }
 0x527   :  { %v3517_v25 = vpop.eup %3516 }
 0x528   :  { %v3519_v28 = vpop.eup %3518  ;;  %v1660_v32 = vadd.f32 1.0, %v3517_v25 }
 0x52a   :  { %3524 = vrcp.f32 %v1660_v32 }
 0x52c   :  { %v3521_v29 = vpop.eup %3520 }
 0x52d   :  { %v3523_v30 = vpop.eup %3522  ;;  %v1664_v31 = vmul.f32 %v3521_v29, %v3519_v28 }
 0x52e   :  { %v1663_v33 = vmul.f32 %v3523_v30, %v3933_v54  ;;  %v1673_v54 = vld [vmem:[#allocation4 + $0x2c] sm:$0x3]  ;;  %v1991_v30 = vld [vmem:[#allocation4 + $0x34] sm:$0x3] }
 0x530   :  { %v3966_v34 = vadd.f32 %v1664_v31, %v1663_v33 }
 0x532   :  { %3526 = vtanh.f32 %v3966_v34 }
 0x534   :  { %v3525_v35 = vpop.eup %3524 }
 0x53c   :  { %v3527_v36 = vpop.eup %3526 }
 0x53d   :  { %v1667_v37 = vmul.f32 %v3527_v36, %v3525_v35 }
 0x53f   :  { %3121 = vmatmul.mubr.msk.f32.vlgmr.msra.gmra.mrb[20].mxu0 %vm84_vm2, %v1667_v37  ;;  %1669 = vst.msk [vmem:[#allocation9 + $0x8] sm:$0x3] %vm55_vm1, %v1667_v37  ;;  %3132 = vmatmul.mubr.msk.f32.vlgmr.msra.gmra.mrb[20].mxu1 %vm84_vm2, %v1667_v37 }
 0x540   :  { %3378 = vmatpush3.bf16.msra.mxu0 %v3793_v19  ;;  %3384 = vmatpush3.bf16.msra.mxu1 %v3795_v20 }
 0x541   :  { %3379 = vmatprep.subr.bf16.mxu0 %v3700_v0  ;;  %3385 = vmatprep.subr.bf16.mxu1 %v3700_v0 }
 0x542   :  { %3142 = vmatprep.mubr.msk.f32.mxu0 %vm3701_vm0, %v3702_v1  ;;  %3153 = vmatprep.mubr.msk.f32.mxu1 %vm3701_vm0, %v3702_v1 }
 0x544   :  { %3381 = vmatpush3.bf16.msra.mxu0 %v3802_v26  ;;  %3387 = vmatpush3.bf16.msra.mxu1 %v3804_v27 }
 0x545   :  { %3388 = vmatprep.subr.bf16.mxu0 %v3700_v0  ;;  %3394 = vmatprep.subr.bf16.mxu1 %v3700_v0 }
 0x547   :  { %3143 = vmatmul.mubr.msk.f32.vlgmr.msra.gmra.mrb[22].mxu0 %vm84_vm2, %v1667_v37  ;;  %3154 = vmatmul.mubr.msk.f32.vlgmr.msra.gmra.mrb[22].mxu1 %vm84_vm2, %v1667_v37 }
 0x548   :  { %3390 = vmatpush3.bf16.msra.mxu0 %v3774_v5  ;;  %3396 = vmatpush3.bf16.msra.mxu1 %v3776_v9 }
 0x549   :  { %3391 = vmatprep.subr.bf16.mxu0 %v3700_v0  ;;  %3397 = vmatprep.subr.bf16.mxu1 %v3700_v0 }
 0x54a   :  { %3164 = vmatprep.mubr.msk.f32.mxu0 %vm3701_vm0, %v3702_v1  ;;  %3175 = vmatprep.mubr.msk.f32.mxu1 %vm3701_vm0, %v3702_v1 }
 0x54c   :  { %3393 = vmatpush3.bf16.msra.mxu0 %v3782_v13  ;;  %3399 = vmatpush3.bf16.msra.mxu1 %v3787_v14 }
 0x54d   :  { %3400 = vmatprep.subr.bf16.mxu0 %v3700_v0  ;;  %3406 = vmatprep.subr.bf16.mxu1 %v3700_v0 }
 0x612   :  { %v1744_v40 = vpop.f32.mrb[20].mxu0  ;;  %v1815_v41 = vpop.f32.mrb[20].mxu1 }
 0x613   :  { %v1748_v42 = vadd.f32 %v1744_v40, %v1671_v38  ;;  %v1819_v43 = vadd.f32 %v1815_v41, %v1672_v39  ;;  %v3122_v44 = vpop.f32.mrb[21].mxu0  ;;  %v3133_v45 = vpop.f32.mrb[21].mxu1 }
 0x615   :  { %v2715_v46 = vmul.f32 -1.442695, %v1748_v42  ;;  %v2716_v47 = vmul.f32 -1.442695, %v1819_v43 }
 0x617   :  { %3528 = vpow2.f32 %v2715_v46 }
 0x618   :  { %3530 = vpow2.f32 %v2716_v47 }
 0x61a   :  { %v1886_v49 = vpop.f32.mrb[22].mxu0  ;;  %v1957_v50 = vpop.f32.mrb[22].mxu1 }
 0x61b   :  { %v1961_v51 = vadd.f32 %v1957_v50, %v1674_v48  ;;  %v3144_v52 = vpop.f32.mrb[23].mxu0  ;;  %v3155_v53 = vpop.f32.mrb[23].mxu1  ;;  %v1890_v56 = vadd.f32 %v1886_v49, %v1673_v54 }
 0x61d   :  { %v2717_v55 = vmul.f32 -1.442695, %v1961_v51 }
 0x61f   :  { %3532 = vpow2.f32 %v2717_v55 }
 0x620   :  { %3534 = vtanh.f32 %v1890_v56 }
 0x621   :  { %v3529_v57 = vpop.eup %3528 }
 0x622   :  { %v3531_v58 = vpop.eup %3530  ;;  %v1965_v59 = vadd.f32 1.0, %v3529_v57 }
 0x623   :  { %v1971_v60 = vadd.f32 1.0, %v3531_v58  ;;  %v2309_v58 = vld [vmem:[#allocation4 + $0x3c] sm:$0x3] }
 0x624   :  { %3536 = vrcp.f32 %v1965_v59 }
 0x625   :  { %3538 = vrcp.f32 %v1971_v60 }
 0x629   :  { %v3533_v61 = vpop.eup %3532 }
 0x62a   :  { %v3535_v62 = vpop.eup %3534  ;;  %v1978_v4 = vadd.f32 1.0, %v3533_v61 }
 0x62c   :  { %3540 = vrcp.f32 %v1978_v4 }
 0x62e   :  { %v3537_v63 = vpop.eup %3536 }
 0x62f   :  { %v3539_v2 = vpop.eup %3538  ;;  %v1982_v3 = vmul.f32 %v3537_v63, %v3535_v62 }
 0x630   :  { %v1981_v6 = vmul.f32 %v3539_v2, %v3966_v34 }
 0x632   :  { %v3999_v7 = vadd.f32 %v1982_v3, %v1981_v6 }
 0x634   :  { %3542 = vtanh.f32 %v3999_v7 }
 0x636   :  { %v3541_v8 = vpop.eup %3540 }
 0x63e   :  { %v3543_v10 = vpop.eup %3542 }
 0x63f   :  { %v1985_v11 = vmul.f32 %v3543_v10, %v3541_v8 }
 0x641   :  { %3165 = vmatmul.mubr.msk.f32.vlgmr.msra.gmra.mrb[24].mxu0 %vm84_vm2, %v1985_v11  ;;  %1987 = vst.msk [vmem:[#allocation9 + $0xa] sm:$0x3] %vm55_vm1, %v1985_v11  ;;  %3176 = vmatmul.mubr.msk.f32.vlgmr.msra.gmra.mrb[24].mxu1 %vm84_vm2, %v1985_v11 }
 0x642   :  { %3402 = vmatpush3.bf16.msra.mxu0 %v3793_v19  ;;  %3408 = vmatpush3.bf16.msra.mxu1 %v3795_v20 }
 0x643   :  { %3403 = vmatprep.subr.bf16.mxu0 %v3700_v0  ;;  %3409 = vmatprep.subr.bf16.mxu1 %v3700_v0 }
 0x644   :  { %3186 = vmatprep.mubr.msk.f32.mxu0 %vm3701_vm0, %v3702_v1  ;;  %3197 = vmatprep.mubr.msk.f32.mxu1 %vm3701_vm0, %v3702_v1 }
 0x646   :  { %3405 = vmatpush3.bf16.msra.mxu0 %v3802_v26  ;;  %3411 = vmatpush3.bf16.msra.mxu1 %v3804_v27 }
 0x647   :  { %3412 = vmatprep.subr.bf16.mxu0 %v3700_v0  ;;  %3418 = vmatprep.subr.bf16.mxu1 %v3700_v0 }
 0x649   :  { %3187 = vmatmul.mubr.msk.f32.vlgmr.msra.gmra.mrb[26].mxu0 %vm84_vm2, %v1985_v11  ;;  %3198 = vmatmul.mubr.msk.f32.vlgmr.msra.gmra.mrb[26].mxu1 %vm84_vm2, %v1985_v11 }
 0x64a   :  { %3414 = vmatpush3.bf16.msra.mxu0 %v3774_v5  ;;  %3420 = vmatpush3.bf16.msra.mxu1 %v3776_v9  ;;  %v1989_v5 = vld [vmem:[#allocation4 + $0x30] sm:$0x3]  ;;  %v1990_v9 = vld [vmem:[#allocation4 + $0x32] sm:$0x3] }
 0x64b   :  { %3415 = vmatprep.subr.bf16.mxu0 %v3700_v0  ;;  %3421 = vmatprep.subr.bf16.mxu1 %v3700_v0 }
 0x64c   :  { %3208 = vmatprep.mubr.msk.f32.mxu0 %vm3701_vm0, %v3702_v1  ;;  %3219 = vmatprep.mubr.msk.f32.mxu1 %vm3701_vm0, %v3702_v1 }
 0x64e   :  { %3417 = vmatpush3.bf16.msra.mxu0 %v3782_v13  ;;  %3423 = vmatpush3.bf16.msra.mxu1 %v3787_v14 }
 0x64f   :  { %3424 = vmatprep.subr.bf16.mxu0 %v3700_v0  ;;  %3430 = vmatprep.subr.bf16.mxu1 %v3700_v0 }
 0x714   :  { %v2062_v12 = vpop.f32.mrb[24].mxu0  ;;  %v2133_v15 = vpop.f32.mrb[24].mxu1 }
 0x715   :  { %v2066_v16 = vadd.f32 %v2062_v12, %v1989_v5  ;;  %v2137_v17 = vadd.f32 %v2133_v15, %v1990_v9  ;;  %v3166_v18 = vpop.f32.mrb[25].mxu0  ;;  %v3177_v21 = vpop.f32.mrb[25].mxu1 }
 0x717   :  { %v2722_v22 = vmul.f32 -1.442695, %v2066_v16  ;;  %v2723_v23 = vmul.f32 -1.442695, %v2137_v17 }
 0x719   :  { %3544 = vpow2.f32 %v2722_v22 }
 0x71a   :  { %3546 = vpow2.f32 %v2723_v23 }
 0x71c   :  { %v2204_v13 = vpop.f32.mrb[26].mxu0  ;;  %v2275_v25 = vpop.f32.mrb[26].mxu1 }
 0x71d   :  { %v2279_v14 = vadd.f32 %v2275_v25, %v1992_v24  ;;  %v3188_v28 = vpop.f32.mrb[27].mxu0  ;;  %v3199_v29 = vpop.f32.mrb[27].mxu1  ;;  %v2208_v32 = vadd.f32 %v2204_v13, %v1991_v30 }
 0x71f   :  { %v2724_v31 = vmul.f32 -1.442695, %v2279_v14 }
 0x721   :  { %3548 = vpow2.f32 %v2724_v31 }
 0x722   :  { %3550 = vtanh.f32 %v2208_v32 }
 0x723   :  { %v3545_v33 = vpop.eup %3544 }
 0x724   :  { %v3547_v34 = vpop.eup %3546  ;;  %v2283_v35 = vadd.f32 1.0, %v3545_v33 }
 0x725   :  { %v2289_v36 = vadd.f32 1.0, %v3547_v34 }
 0x726   :  { %3552 = vrcp.f32 %v2283_v35 }
 0x727   :  { %3554 = vrcp.f32 %v2289_v36 }
 0x72b   :  { %v3549_v37 = vpop.eup %3548 }
 0x72c   :  { %v3551_v38 = vpop.eup %3550  ;;  %v2296_v42 = vadd.f32 1.0, %v3549_v37 }
 0x72e   :  { %3556 = vrcp.f32 %v2296_v42 }
 0x730   :  { %v3553_v39 = vpop.eup %3552 }
 0x731   :  { %v3555_v40 = vpop.eup %3554  ;;  %v2300_v41 = vmul.f32 %v3553_v39, %v3551_v38 }
 0x732   :  { %v2299_v43 = vmul.f32 %v3555_v40, %v3999_v7 }
 0x734   :  { %v2301_v44 = vadd.f32 %v2300_v41, %v2299_v43 }
 0x736   :  { %3558 = vtanh.f32 %v2301_v44 }
 0x738   :  { %v3557_v45 = vpop.eup %3556 }
 0x740   :  { %v3559_v46 = vpop.eup %3558 }
 0x741   :  { %v2303_v47 = vmul.f32 %v3559_v46, %v3557_v45 }
 0x743   :  { %3209 = vmatmul.mubr.msk.f32.vlgmr.msra.gmra.mrb[28].mxu0 %vm84_vm2, %v2303_v47  ;;  %2305 = vst.msk [vmem:[#allocation9 + $0xc] sm:$0x3] %vm55_vm1, %v2303_v47  ;;  %3220 = vmatmul.mubr.msk.f32.vlgmr.msra.gmra.mrb[28].mxu1 %vm84_vm2, %v2303_v47 }
 0x744   :  { %3426 = vmatpush3.bf16.msra.mxu0 %v3793_v19  ;;  %3432 = vmatpush3.bf16.msra.mxu1 %v3795_v20  ;;  %v2307_v19 = vld [vmem:[#allocation4 + $0x38] sm:$0x3]  ;;  %v2308_v20 = vld [vmem:[#allocation4 + $0x3a] sm:$0x3] }
 0x745   :  { %3427 = vmatprep.subr.bf16.mxu0 %v3700_v0  ;;  %3433 = vmatprep.subr.bf16.mxu1 %v3700_v0 }
 0x746   :  { %3230 = vmatprep.mubr.msk.f32.mxu0 %vm3701_vm0, %v3702_v1  ;;  %3241 = vmatprep.mubr.msk.f32.mxu1 %vm3701_vm0, %v3702_v1  ;;  %v2310_v1 = vld [vmem:[#allocation4 + $0x3e] sm:$0x3] }
 0x748   :  { %3429 = vmatpush3.bf16.msra.mxu0 %v3802_v26  ;;  %3435 = vmatpush3.bf16.msra.mxu1 %v3804_v27 }
 0x74b   :  { %3231 = vmatmul.mubr.msk.f32.vlgmr.msra.gmra.mrb[30].mxu0 %vm84_vm2, %v2303_v47  ;;  %3242 = vmatmul.mubr.msk.f32.vlgmr.msra.gmra.mrb[30].mxu1 %vm84_vm2, %v2303_v47 }
 0x816   :  { %v2380_v48 = vpop.f32.mrb[28].mxu0  ;;  %v2451_v49 = vpop.f32.mrb[28].mxu1 }
 0x817   :  { %v2384_v50 = vadd.f32 %v2380_v48, %v2307_v19  ;;  %v2455_v0 = vadd.f32 %v2451_v49, %v2308_v20  ;;  %v3210_v51 = vpop.f32.mrb[29].mxu0  ;;  %v3221_v52 = vpop.f32.mrb[29].mxu1 }
 0x819   :  { %v2729_v53 = vmul.f32 -1.442695, %v2384_v50  ;;  %v2730_v54 = vmul.f32 -1.442695, %v2455_v0 }
 0x81b   :  { %3560 = vpow2.f32 %v2729_v53 }
 0x81c   :  { %3562 = vpow2.f32 %v2730_v54 }
 0x81e   :  { %v2522_v26 = vpop.f32.mrb[30].mxu0  ;;  %v2593_v55 = vpop.f32.mrb[30].mxu1 }
 0x81f   :  { %v2597_v27 = vadd.f32 %v2593_v55, %v2310_v1  ;;  %v3232_v56 = vpop.f32.mrb[31].mxu0  ;;  %v3243_v57 = vpop.f32.mrb[31].mxu1  ;;  %v2526_v60 = vadd.f32 %v2522_v26, %v2309_v58 }
 0x821   :  { %v2731_v59 = vmul.f32 -1.442695, %v2597_v27 }
 0x823   :  { %3564 = vpow2.f32 %v2731_v59 }
 0x824   :  { %3566 = vtanh.f32 %v2526_v60 }
 0x825   :  { %v3561_v61 = vpop.eup %3560 }
 0x826   :  { %v3563_v62 = vpop.eup %3562  ;;  %v2601_v63 = vadd.f32 1.0, %v3561_v61 }
 0x827   :  { %v2607_v2 = vadd.f32 1.0, %v3563_v62 }
 0x828   :  { %3568 = vrcp.f32 %v2601_v63 }
 0x829   :  { %3570 = vrcp.f32 %v2607_v2 }
 0x82d   :  { %v3565_v3 = vpop.eup %3564 }
 0x82e   :  { %v3567_v4 = vpop.eup %3566  ;;  %v2614_v10 = vadd.f32 1.0, %v3565_v3 }
 0x830   :  { %3572 = vrcp.f32 %v2614_v10 }
 0x832   :  { %v3569_v6 = vpop.eup %3568 }
 0x833   :  { %v3571_v7 = vpop.eup %3570  ;;  %v2618_v8 = vmul.f32 %v3569_v6, %v3567_v4 }
 0x834   :  { %v2617_v11 = vmul.f32 %v3571_v7, %v2301_v44 }
 0x836   :  { %v2619_v5 = vadd.f32 %v2618_v8, %v2617_v11 }
 0x838   :  { %2625 = vst.msk [vmem:[#allocation3] sm:$0x3] %vm55_vm1, %v2619_v5  ;;  %2630 = vst.msk [vmem:[#allocation12] sm:$0x3] %vm55_vm1, %v2619_v5  ;;  %3574 = vtanh.f32 %v2619_v5 }
 0x83a   :  { %v3573_v9 = vpop.eup %3572 }
 0x842   :  { %v3575_v12 = vpop.eup %3574 }
 0x843   :  { %v2621_v15 = vmul.f32 %v3575_v12, %v3573_v9 }
 0x845   :  { %2623 = vst.msk [vmem:[#allocation9 + $0xe] sm:$0x3] %vm55_vm1, %v2621_v15  ;;  %2624 = vst.msk [vmem:[#allocation2] sm:$0x3] %vm55_vm1, %v2621_v15 }
 0x846   :  { %2629 = vst.msk [vmem:[#allocation10] sm:$0x3] %vm55_vm1, %v2621_v15 }
 0x847   :  { %3631 = shalt.err (!%p3628_p6)
}
 0x848   :  { %s3632_s12 = scalar_lea.hbm %s4110_s5, 32 }
 0x849   :  { %p3633_p7 = scmp.ne.s32.totalorder %s4110_s5, %s3632_s12  ;;  %p3636_p8 = scmp.lt.u32.totalorder %s3632_s12, %s4110_s5 }
 0x84b   :  { %p3638_p9 = pnand %p3636_p8, %p3633_p7 }
 0x84d   :  { %3641 = shalt.err (!%p3638_p9)
}
 0x84e   :  { %2652 = dma.vmem_to_hbm [thread:$0]  %s2650_s26, 32, %s4110_s5, [#allocation11]  }
 0x84f   :  { %s3642_s19 = scalar_lea.vmem %s4049_s28, 256  ;;  %p3647_p11 = scmp.lt.s32.totalorder %s4049_s28, %s4049_s28 }
 0x850   :  { %p3643_p10 = scmp.ne.s32.totalorder %s4049_s28, %s3642_s19  ;;  %p3648_p12 = scmp.lt.s32.totalorder %s3642_s19, %s3642_s19 }
 0x852   :  { %p3649_p13 = por %p3648_p12, %p3647_p11 }
 0x854   :  { %p3650_p0 = pnand %p3649_p13, %p3643_p10 }
 0x856   :  { %3653 = shalt.err (!%p3650_p0)
}
 0x857   :  { %s3654_s21 = scalar_lea.hbm %s4109_s4, 256 }
 0x858   :  { %p3655_p1 = scmp.ne.s32.totalorder %s4109_s4, %s3654_s21  ;;  %p3658_p2 = scmp.lt.u32.totalorder %s3654_s21, %s4109_s4 }
 0x85a   :  { %p3660_p3 = pnand %p3658_p2, %p3655_p1 }
 0x85c   :  { %3663 = shalt.err (!%p3660_p3)
}
 0x85d   :  { %2642 = dma.vmem_to_hbm [thread:$0]  %s4049_s28, 256, %s4109_s4, [#allocation6], %s3695_s7, %s3695_s7, %s3696_s8  }
 0x85e   :  { %s3664_s25 = scalar_lea.vmem %s4054_s30, 32  ;;  %p3669_p5 = scmp.lt.s32.totalorder %s4054_s30, %s4054_s30 }
 0x85f   :  { %p3665_p4 = scmp.ne.s32.totalorder %s4054_s30, %s3664_s25  ;;  %p3670_p6 = scmp.lt.s32.totalorder %s3664_s25, %s3664_s25 }
 0x861   :  { %p3671_p7 = por %p3670_p6, %p3669_p5 }
 0x863   :  { %p3672_p8 = pnand %p3671_p7, %p3665_p4 }
 0x865   :  { %3675 = shalt.err (!%p3672_p8)
}
 0x866   :  { %s3676_s27 = scalar_lea.hbm %s4111_s6, 32 }
 0x867   :  { %p3677_p9 = scmp.ne.s32.totalorder %s4111_s6, %s3676_s27  ;;  %p3680_p10 = scmp.lt.u32.totalorder %s3676_s27, %s4111_s6 }
 0x869   :  { %p3682_p11 = pnand %p3680_p10, %p3677_p9 }
 0x86b   :  { %3685 = shalt.err (!%p3682_p11)
}
 0x86c   :  { %2662 = dma.vmem_to_hbm [thread:$0]  %s4054_s30, 32, %s4111_s6, [#allocation11]  }
 0x86d   :  { %3690 = dma.done.wait [#allocation6], 256  }
 0x86e   :  { %3691 = vsyncadd [#allocation6], 4294967040 }
 0x86f   :  { %3692 = dma.done.wait [#allocation11], 64  }
 0x870   :  { %3693 = vsyncadd [#allocation11], 4294967232 }
 0x871   :  { %2672 = vsyncpa [#allocation5], 1 }
 0x872   :  { %2673 = vsyncpa [#allocation8], 1 }
 0x873   :  { %2674 = vsyncpa [#allocation6], 1 }
 0x874   :  { %2675 = vsyncpa [#allocation11], 1 }

</bundles_post_ra>
